<compile_context>
chip_gen: v7x
topology: tpu7x:2x2x1
jax: 0.10.0
libtpu: 0.0.40
codegen_flags: <defaults>
</compile_context>

<pallas_src>
import functools

import jax
import jax.numpy as jnp
from jax.experimental import pallas as pl
from jax.experimental.pallas import tpu as pltpu


# ---------------------------------------------------------------------------
# Kernel
# ---------------------------------------------------------------------------
def _write_pieces(out_ref, pieces, axis, use_concat):
    """Store `pieces` side by side along `axis` into out_ref.

    use_concat=True  -> one dense unmasked store of the whole canvas.
    use_concat=False -> disjoint static-offset stores (each output element is
                        still written exactly once); used when piece sizes are
                        not vreg-aligned.
    """
    pieces = [p for p in pieces if p.shape[axis] > 0]
    if len(pieces) == 1:
        out_ref[...] = pieces[0]
        return
    if use_concat:
        out_ref[...] = jnp.concatenate(pieces, axis=axis)
        return
    off = 0
    for p in pieces:
        n = p.shape[axis]
        if axis == 1:
            out_ref[:, off:off + n, :] = p
        else:
            out_ref[:, :, off:off + n] = p
        off += n


@functools.lru_cache(maxsize=None)
def _make_square_pad_call(n_imgs, c, h, w, dtype_name, centre_pad, fill_value):
    """Batched square-pad for `n_imgs` images of identical shape (c, h, w)."""
    dtype = jnp.dtype(dtype_name)
    s = max(h, w)

    # Static (trace-time) alignment checks: pick the single-concat store when
    # the pieces are sublane/lane aligned, otherwise disjoint static stores.
    rows_aligned = (h % 8 == 0) and (s % 8 == 0) and (
        not centre_pad or ((s - h) // 2) % 8 == 0)
    cols_aligned = (w % 128 == 0) and (s % 128 == 0) and (
        not centre_pad or ((s - w) // 2) % 128 == 0)

    def kernel(flag_ref, img_ref, out_ref):
        # flag_ref: SMEM int32[n_imgs]; 1 -> image first (pad after), 0 -> pad
        # first (image after).  Unused for centre_pad.
        i = pl.program_id(0)
        img = img_ref[...]                               # (c, h, w)

        if h < s:
            # Landscape: pad along rows (sublane axis). Width is already s.
            axis, pad_n, aligned = 1, s - h, rows_aligned
            full = lambda n: jnp.full((c, n, s), fill_value, dtype=dtype)
        elif w < s:
            # Portrait: pad along columns (lane axis). Height is already s.
            axis, pad_n, aligned = 2, s - w, cols_aligned
            full = lambda n: jnp.full((c, s, n), fill_value, dtype=dtype)
        else:
            # Already square (host skips this case; kept for safety).
            out_ref[...] = img
            return

        if centre_pad:
            lead = pad_n // 2
            _write_pieces(out_ref, [full(lead), img, full(pad_n - lead)],
                          axis, aligned)
        else:
            pad = full(pad_n)                            # trace-time constant
            img_first = flag_ref[i] != 0

            @pl.when(img_first)
            def _():
                _write_pieces(out_ref, [img, pad], axis, aligned)

            @pl.when(jnp.logical_not(img_first))
            def _():
                _write_pieces(out_ref, [pad, img], axis, aligned)

    itemsize = dtype.itemsize
    in_bytes = c * h * w * itemsize
    out_bytes = c * s * s * itemsize
    # Double-buffered in + out blocks, plus the constant pad pieces and slack.
    needed = 2 * (in_bytes + out_bytes) + (out_bytes - in_bytes) + (1 << 20)
    vmem_limit = int(min(64 * 2**20, max(needed, 16 * 2**20)))

    grid_spec = pltpu.PrefetchScalarGridSpec(
        num_scalar_prefetch=1,
        grid=(n_imgs,),
        in_specs=[pl.BlockSpec((None, c, h, w), lambda i, flags: (i, 0, 0, 0))],
        out_specs=pl.BlockSpec((None, c, s, s), lambda i, flags: (i, 0, 0, 0)),
    )
    call = pl.pallas_call(
        kernel,
        out_shape=jax.ShapeDtypeStruct((n_imgs, c, s, s), dtype),
        grid_spec=grid_spec,
        compiler_params=pltpu.CompilerParams(
            dimension_semantics=("parallel",),
            vmem_limit_bytes=vmem_limit,
        ),
    )
    # TODO(synk): for very large canvases (C*S*S*itemsize >> VMEM) add a
    # row-tile grid axis and skip the input DMA for pure-fill row bands; the
    # whole-canvas block is fine at typical mosaic sizes.
    return jax.jit(call)


# ---------------------------------------------------------------------------
# Host-side forward (mirrors SquarePad.forward semantics)
# ---------------------------------------------------------------------------
def _plan(h, w, pos, centre_pad):
    """(pad_top, pad_left, box_dx, box_dy) following the torch SquarePad rules."""
    s = max(h, w)
    p_top, p_left = (s - h) // 2, (s - w) // 2
    p_bottom, p_right = s - h - p_top, s - w - p_left
    if centre_pad:
        return p_top, p_left, p_left, p_top
    if pos == "tl":
        return p_top + p_bottom, p_left + p_right, p_left + p_right, p_top + p_bottom
    if pos == "tr":
        return p_top + p_bottom, 0, 0, p_top + p_bottom
    if pos == "bl":
        return 0, p_left + p_right, p_left + p_right, 0
    return 0, 0, 0, 0  # "br"


def square_pad_forward(images, targets, *, centre_pad=False, fill_value=114):
    """JAX/Pallas equivalent of SquarePad.forward.

    images : sequence of (C, H, W) arrays
    targets: sequence of dicts with a 'boxes' key holding (N, 4) xyxy arrays
    Images in an incomplete trailing group (<4) are left untransformed,
    matching grouper(..., incomplete='ignore').
    """
    if len(images) != len(targets):
        raise ValueError("Unequal number of images and targets.")
    if not all("boxes" in t for t in targets):
        raise ValueError('All targets must have a "boxes" key.')

    images = list(images)
    targets = [dict(t) for t in targets]
    positions = ("tl", "tr", "bl", "br")

    # Plan every image that needs padding; bucket by (shape, dtype) so each
    # distinct shape is handled by ONE batched pallas_call (compile count =
    # number of shapes, independent of mosaic position / pad offsets).
    jobs = {}
    for start in range(0, (len(images) // 4) * 4, 4):
        for offset, pos in enumerate(positions):
            i = start + offset
            c, h, w = images[i].shape
            if h == w:
                continue
            pad_top, pad_left, dx, dy = _plan(h, w, pos, centre_pad)
            key = (c, h, w, jnp.dtype(images[i].dtype).name)
            # Single placement flag: exactly one axis pads (S == max(H, W)),
            # so "image first" <=> both leading pads are zero.
            jobs.setdefault(key, []).append((i, int(pad_top + pad_left == 0)))
            if dx or dy:
                # Tiny (N, 4) add: plain jnp; a Pallas launch here is pure
                # overhead (4-lane-wide masked stores + extra dispatch).
                shift = jnp.asarray([dx, dy, dx, dy],
                                    dtype=targets[i]["boxes"].dtype)
                targets[i]["boxes"] = targets[i]["boxes"] + shift

    for (c, h, w, dtype_name), entries in jobs.items():
        idxs = [e[0] for e in entries]
        flags = jnp.asarray([e[1] for e in entries], dtype=jnp.int32)
        batch = jnp.stack([images[i] for i in idxs], axis=0)
        call = _make_square_pad_call(len(idxs), c, h, w, dtype_name,
                                     bool(centre_pad), int(fill_value))
        padded = call(flags, batch)
        for slot, i in enumerate(idxs):
            images[i] = padded[slot]

    # TODO(synk): tv_tensors.Image / BoundingBoxes metadata and the remaining
    # Python-level validation warnings have no Pallas equivalent (host glue).
    return tuple(images), tuple(targets)


# ---------------------------------------------------------------------------
# Demo / self-check
# ---------------------------------------------------------------------------
if __name__ == "__main__":
    root = jax.random.PRNGKey(0)
    FILL = 114
    C, N_BOXES = 4, 5
    SHAPE_A = (C, 16, 128)    # landscape -> pads rows,     S = 128
    SHAPE_B = (C, 256, 128)   # portrait  -> pads columns,  S = 256
    SHAPE_SQ = (C, 128, 128)  # already square -> untouched
    # 8 images (two complete mosaic groups) + 1 trailing image (ignored group).
    shapes = [SHAPE_B, SHAPE_A, SHAPE_A, SHAPE_B,
              SHAPE_A, SHAPE_B, SHAPE_B, SHAPE_A, SHAPE_SQ]

    def make_inputs(key, shape_list):
        imgs, tgts = [], []
        for n, shp in enumerate(shape_list):
            k_img, k_xy, k_wh = jax.random.split(jax.random.fold_in(key, n), 3)
            _, h, w = shp
            imgs.append(jax.random.uniform(k_img, shp, dtype=jnp.float32) * 255.0)
            xy = jax.random.uniform(k_xy, (N_BOXES, 2), dtype=jnp.float32,
                                    minval=0.0, maxval=min(h, w) / 2)
            wh = jax.random.uniform(k_wh, (N_BOXES, 2), dtype=jnp.float32,
                                    minval=1.0, maxval=min(h, w) / 2)
            tgts.append({"boxes": jnp.concatenate([xy, xy + wh], axis=-1)})
        return tuple(imgs), tuple(tgts)

    def check(images_in, targets_in, images_out, targets_out, centre_pad):
        positions = ("tl", "tr", "bl", "br")
        n_complete = (len(images_in) // 4) * 4
        for i in range(len(images_in)):
            c, h, w = images_in[i].shape
            if i >= n_complete or h == w:
                assert bool(jnp.array_equal(images_out[i], images_in[i])), f"img {i}"
                assert bool(jnp.array_equal(targets_out[i]["boxes"],
                                            targets_in[i]["boxes"])), f"box {i}"
                continue
            s = max(h, w)
            pt, plft, dx, dy = _plan(h, w, positions[i % 4], centre_pad)
            ref_img = jnp.pad(
                images_in[i],
                ((0, 0), (pt, s - h - pt), (plft, s - w - plft)),
                constant_values=float(FILL))
            assert images_out[i].shape == (c, s, s), f"shape {i}"
            assert bool(jnp.array_equal(images_out[i], ref_img)), f"img {i}"
            shift = jnp.asarray([dx, dy, dx, dy], dtype=jnp.float32)
            ref_box = targets_in[i]["boxes"] + shift
            assert bool(jnp.array_equal(targets_out[i]["boxes"], ref_box)), f"box {i}"

    # --- default (outer) padding ---------------------------------------------
    imgs, tgts = make_inputs(root, shapes)
    out_imgs, out_tgts = square_pad_forward(imgs, tgts, centre_pad=False,
                                            fill_value=FILL)
    jax.block_until_ready((out_imgs, tuple(t["boxes"] for t in out_tgts)))
    check(imgs, tgts, out_imgs, out_tgts, centre_pad=False)

    # --- centre padding --------------------------------------------------------
    imgs_c, tgts_c = make_inputs(jax.random.fold_in(root, 999), [SHAPE_A] * 4)
    out_imgs_c, out_tgts_c = square_pad_forward(imgs_c, tgts_c, centre_pad=True,
                                                fill_value=FILL)
    jax.block_until_ready((out_imgs_c, tuple(t["boxes"] for t in out_tgts_c)))
    check(imgs_c, tgts_c, out_imgs_c, out_tgts_c, centre_pad=True)

    print("KERNEL_OK")
</pallas_src>

<mosaic_0001>
module attributes {stable_mosaic.version = 11 : i64} {
  func.func @kernel(%arg0: i32, %arg1: memref<4xi32, #tpu.memory_space<smem>>, %arg2: memref<1x4x256x128xf32, #tpu.memory_space<vmem>>, %arg3: memref<1x4x256x256xf32, #tpu.memory_space<vmem>>) attributes {dimension_semantics = [#tpu.dimension_semantics<parallel>], iteration_bounds = array<i64: 4>, scalar_prefetch = 1 : i64, scratch_operands = 0 : i64, tpu.core_type = #tpu.core_type<tc>, window_params = [{transform_indices = @transform_0, window_bounds = array<i64: 1, 4, 256, 128>}, {transform_indices = @transform_1, window_bounds = array<i64: 1, 4, 256, 256>}]} {
    %c0 = arith.constant 0 : index
    %c0_0 = arith.constant 0 : index
    %c0_1 = arith.constant 0 : index
    %c0_2 = arith.constant 0 : index
    %0 = vector.load %arg2[%c0, %c0_0, %c0_1, %c0_2] : memref<1x4x256x128xf32, #tpu.memory_space<vmem>>, vector<1x4x256x128xf32>
    %1 = vector.shape_cast %0 : vector<1x4x256x128xf32> to vector<4x256x128xf32>
    %cst = arith.constant 1.140000e+02 : f32
    %2 = vector.broadcast %cst : f32 to vector<4x256x128xf32>
    %3 = arith.index_cast %arg0 : i32 to index
    %4 = memref.load %arg1[%3] : memref<4xi32, #tpu.memory_space<smem>>
    %c0_i32 = arith.constant 0 : i32
    %5 = arith.cmpi ne, %4, %c0_i32 : i32
    %6 = arith.extui %5 : i1 to i32
    %c0_i32_3 = arith.constant 0 : i32
    %7 = arith.cmpi ne, %6, %c0_i32_3 : i32
    scf.if %7 {
      %11 = tpu.concatenate %1, %2 in 2 : vector<4x256x128xf32>, vector<4x256x128xf32> -> vector<4x256x256xf32>
      %c0_5 = arith.constant 0 : index
      %c0_6 = arith.constant 0 : index
      %c0_7 = arith.constant 0 : index
      %c0_8 = arith.constant 0 : index
      %12 = vector.load %arg3[%c0_5, %c0_6, %c0_7, %c0_8] : memref<1x4x256x256xf32, #tpu.memory_space<vmem>>, vector<1x4x256x256xf32>
      %13 = vector.shape_cast %12 : vector<1x4x256x256xf32> to vector<4x256x256xf32>
      %14 = vector.shape_cast %11 : vector<4x256x256xf32> to vector<1x4x256x256xf32>
      tpu.vector_store %arg3[%c0_5, %c0_6, %c0_7, %c0_8], %14 {strides = array<i32>} : memref<1x4x256x256xf32, #tpu.memory_space<vmem>>, vector<1x4x256x256xf32>,
    } else {
    }
    %true = arith.constant true
    %8 = arith.xori %5, %true : i1
    %9 = arith.extui %8 : i1 to i32
    %c0_i32_4 = arith.constant 0 : i32
    %10 = arith.cmpi ne, %9, %c0_i32_4 : i32
    scf.if %10 {
      %11 = tpu.concatenate %2, %1 in 2 : vector<4x256x128xf32>, vector<4x256x128xf32> -> vector<4x256x256xf32>
      %c0_5 = arith.constant 0 : index
      %c0_6 = arith.constant 0 : index
      %c0_7 = arith.constant 0 : index
      %c0_8 = arith.constant 0 : index
      %12 = vector.load %arg3[%c0_5, %c0_6, %c0_7, %c0_8] : memref<1x4x256x256xf32, #tpu.memory_space<vmem>>, vector<1x4x256x256xf32>
      %13 = vector.shape_cast %12 : vector<1x4x256x256xf32> to vector<4x256x256xf32>
      %14 = vector.shape_cast %11 : vector<4x256x256xf32> to vector<1x4x256x256xf32>
      tpu.vector_store %arg3[%c0_5, %c0_6, %c0_7, %c0_8], %14 {strides = array<i32>} : memref<1x4x256x256xf32, #tpu.memory_space<vmem>>, vector<1x4x256x256xf32>,
    } else {
    }
    return
  }
  func.func @transform_0(%arg0: i32, %arg1: memref<4xi32, #tpu.memory_space<smem>>) -> (i32, i32, i32, i32) {
    %c0_i32 = arith.constant 0 : i32
    %c0_i32_0 = arith.constant 0 : i32
    %c0_i32_1 = arith.constant 0 : i32
    %c0_i32_2 = arith.constant 0 : i32
    return %arg0, %c0_i32, %c0_i32_0, %c0_i32_1 : i32, i32, i32, i32
  }
  func.func @transform_1(%arg0: i32, %arg1: memref<4xi32, #tpu.memory_space<smem>>) -> (i32, i32, i32, i32) {
    %c0_i32 = arith.constant 0 : i32
    %c0_i32_0 = arith.constant 0 : i32
    %c0_i32_1 = arith.constant 0 : i32
    %c0_i32_2 = arith.constant 0 : i32
    return %arg0, %c0_i32, %c0_i32_0, %c0_i32_1 : i32, i32, i32, i32
  }
}

</mosaic_0001>

<bundles_post_ra>
// kernel: tpu_custom_call.1
= control target key start
LH: loop header
LB: loop body
LE: loop exit
PB: predicated region body
PF: predicated region fallthrough
CT: control target
= control target key end

     0   :  { %s2674_s0 = inlined_call_operand.hbm [shape: s32[4], index: 0, kind: input, shape index: {}]   ;;  %s2675_s1 = inlined_call_operand.hbm [shape: f32[4,4,256,128], index: 1, kind: input, shape index: {}]   ;;  %s2676_s2 = inlined_call_operand.hbm [shape: f32[4,4,256,256], index: 2, kind: output, shape index: {}]  }
   0x1   :  { %s947_s11 = scalar_lea.hbm %s2674_s0, 16 }
   0x2   :  { %p948_p0 = scmp.ne.s32.totalorder %s2674_s0, %s947_s11  ;;  %p951_p1 = scmp.lt.u32.totalorder %s947_s11, %s2674_s0 }
   0x4   :  { %p953_p2 = pnand %p951_p1, %p948_p0 }
   0x6   :  { %956 = shalt.err (!%p953_p2)  }
   0x7   :  { %s1057_s16 = smov [#allocation3]  }
   0x8   :  { %8 = dma.hbm_to_smem %s2674_s0, 16, %s1057_s16, [#allocation2] }
   0x9   :  { %1031 = dma.done.wait [#allocation2], 16 }
   0xa   :  { %1032 = vsyncadd [#allocation2], 4294967280 }
   0xb   :  { %10 = sfence }
   0xc   :  { %11 = vsyncpa [#allocation5], 0 }
   0xd   :  { %13 = vsyncpa [#allocation5 + $0x1], 0 }
   0xe   :  { %14 = vsyncpa [#allocation6], 0 }
   0xf   :  { %16 = vsyncpa [#allocation6 + $0x1], 0  ;;  %s1093_s19 = smov 0   ;;  %s1095_s20 = smov 0  }
  0x10   :  { %s1097_s21 = smov 0   ;;  %s1099_s22 = smov 0  }
  0x11 LB: > { %s1114_s0 = sadd.s32 4294967295, %s1055_s22   ;;  %s876_s23 = sadd.s32 4294967294, %s1055_s22   ;;  %s1055_s22 = sphi %s1099_s22, %s2904_s22   ;;  %s1051_s21 = sphi %s1097_s21, %s2903_s21   ;;  %s1047_s20 = sphi %s1095_s20, %s2902_s20   ;;  %s1043_s19 = sphi %s1093_s19, %s2901_s19  }
  0x12   : > { %s1118_s24 = sadd.s32 1, %s1055_s22   ;;  %s29_s25 = sadd.s32 1, %s1051_s21 }
  0x13   : > { %s26_s26 = ssub.s32 %s1055_s22, %s1118_s24  ;;  %p36_p3 = scmp.ne.s32.totalorder %s1051_s21, %s1047_s20 }
  0x14   : > { %p27_p4 = scmp.eq.s32.totalorder %s26_s26, 0  ;;  %p37_p5 = scmp.eq.s32.totalorder %s1055_s22, 0 }
  0x15   : > { %p42_p6 = scmp.ne.s32.totalorder %s1047_s20, %s1043_s19  ;;  %p43_p7 = scmp.eq.s32.totalorder %s1114_s0, 0 }
  0x16   : > { %s1130_s27 = scalar_select %p27_p4, %s1051_s21, %s29_s25  }
  0x17   : > { %p1132_p8 = por %p37_p5, %p36_p3  ;;  %p1136_p9 = por %p43_p7, %p42_p6 }
  0x18   : > { %p66_p10 = scmp.eq.s32.totalorder %s1114_s0, 3  ;;  %p72_p11 = scmp.eq.s32.totalorder %s876_s23, 3 }
  0x19   : > { %p906_p12 = scmp.lt.s32.totalorder %s1055_s22, 4  ;;  %s92_s4 = sand.u32 1, %s1051_s21  }
  0x1a   : > { %p1142_p13 = por %p66_p10, %p36_p3  ;;  %p1146_p0 = por %p72_p11, %p42_p6 }
  0x1b   : > { %s892_s5 = sshll.u32 %s1055_s22, 14  ;;  %s879_s6 = sshll.u32 %s92_s4, 10 }
  0x1c   : > { %s2688_s30 = scalar_select %p1142_p13, 1, 0 }
  0x1d   : > { %s2689_s3 = scalar_select %p1146_p0, 1, 0 }
  0x1e   : > { %s1155_s9 = scalar_lea.hbm %s2675_s1, %s892_s5  ;;  %s96_s10 = scalar_lea.vmem [#allocation4], %s879_s6 }
  0x1f   : > { %s103_s11 = sshll.u32 %s96_s10, 4  ;;  %p1159_p1 = pnand %p906_p12, %p1132_p8  ;;  %s1163_s11 = int_to_ptr.vmem [resolvable:$true] %s103_s11 }
  0x20   : > { %s1165_s13 = scalar_lea.sflag [#allocation5], %s92_s4  ;;  %s957_s14 = scalar_lea.hbm %s1155_s9, 16384 }
  0x21   : > { %p958_p2 = scmp.ne.s32.totalorder %s1155_s9, %s957_s14  ;;  %p959_p3 = pneg %p1159_p1 }
  0x22   : > { %s962_s17 = scalar_lea.hbm %s2675_s1, 65536  ;;  %p963_p6 = scmp.lt.u32.totalorder %s1155_s9, %s2675_s1 }
  0x23   : > { %p960_p4 = pnand %p959_p3, %p958_p2  ;;  %p964_p7 = scmp.lt.u32.totalorder %s962_s17, %s957_s14 }
  0x24   : > { %p966_p10 = scmp.lt.u32.totalorder %s957_s14, %s1155_s9 }
  0x25   : > { %p961_p5 = pneg %p960_p4  ;;  %p965_p8 = por %p964_p7, %p963_p6 }
  0x27   : > { %p967_p11 = por %p966_p10, %p965_p8 }
  0x29   : > { %p968_p12 = pnand %p967_p11, %p961_p5 }
  0x2b   : > { %971 = shalt.err (!%p968_p12)
}
  0x2c   : > { %s972_s25 = scalar_lea.vmem %s1163_s11, 16384  ;;  %s1058_s26 = smov [#allocation4]  }
  0x2d   : > { %p973_p2 = scmp.ne.s32.totalorder %s1163_s11, %s972_s25  ;;  %s977_s28 = sshll.u32 %s1058_s26, 4  ;;  %s978_s28 = int_to_ptr.vmem [resolvable:$false] %s977_s28 }
  0x2e   : > { %s979_s4 = scalar_lea.vmem %s978_s28, 32768  ;;  %p980_p13 = scmp.lt.s32.totalorder %s1163_s11, %s978_s28 }
  0x2f   : > { %p975_p4 = pnand %p973_p2, %p959_p3  ;;  %p981_p6 = scmp.lt.s32.totalorder %s979_s4, %s972_s25 }
  0x31   : > { %p976_p0 = pneg %p975_p4  ;;  %p982_p7 = por %p981_p6, %p980_p13 }
  0x33   : > { %p983_p8 = pnand %p982_p7, %p976_p0 }
  0x35   : > { %986 = shalt.err (!%p983_p8)
}
  0x36   : > { %s1059_s5 = smov 128   ;;  %s1060_s6 = smov 8  }
  0x37   : > { %901 = dma.hbm_to_vmem [thread:$0]  (!%p1159_p1), %s1155_s9, 16384, %s1163_s11, %s1165_s13, %s1059_s5, %s1059_s5, %s1060_s6  }
  0x38   : > { %p882_p3 = scmp.ge.s32.totalorder %s1055_s22, 1  ;;  %p111_p5 = scmp.lt.s32.totalorder %s1055_s22, 5 }
  0x3a   : > { %p112_p10 = pnand %p882_p3, %p111_p5 }
  0x3c   : > { %115 = sbr.rel (%p112_p10) target bundleno = 403 (0x193), region = 24 }
  0x43   : > { %s1196_s7 = sand.u32 1, %s1047_s20  }
  0x44   : > { %s883_s8 = sshll.u32 %s1196_s7, 10  ;;  %s118_s10 = scalar_lea.sflag [#allocation5], %s1196_s7 }
  0x45   : > { %s1200_s14 = scalar_lea.vmem [#allocation4], %s883_s8 }
  0x46   : > { %1034 = dma.done.wait (%p1136_p9), %s118_s10, 16384  }
  0x47   : > { %1036 = vsyncadd (%p1136_p9), %s118_s10, 4294950912  ;;  %s884_s9 = sshll.u32 %s1196_s7, 11  ;;  %s1208_s29 = sld [smem:[#allocation3 + %s1114_s0]]  ;;  %v1211_v0 = vld [vmem:[%s1200_s14] sm:$0xff]  ;;  %v1214_v1 = vld [vmem:[%s1200_s14 + $0x8] sm:$0xff] }
  0x48   : > { %v1217_v2 = vld [vmem:[%s1200_s14 + $0x10] sm:$0xff]  ;;  %v1220_v3 = vld [vmem:[%s1200_s14 + $0x18] sm:$0xff]  ;;  %v1223_v4 = vld [vmem:[%s1200_s14 + $0x20] sm:$0xff]  ;;  %s1596_s11 = scalar_lea.vmem [#allocation7], %s884_s9 }
  0x49   : > { %v1226_v5 = vld [vmem:[%s1200_s14 + $0x28] sm:$0xff]  ;;  %v1229_v6 = vld [vmem:[%s1200_s14 + $0x30] sm:$0xff]  ;;  %v1232_v7 = vld [vmem:[%s1200_s14 + $0x38] sm:$0xff] }
  0x4a   : > { %v1235_v8 = vld [vmem:[%s1200_s14 + $0x40] sm:$0xff]  ;;  %v1238_v9 = vld [vmem:[%s1200_s14 + $0x48] sm:$0xff]  ;;  %v1241_v10 = vld [vmem:[%s1200_s14 + $0x50] sm:$0xff] }
  0x4b   : > { %v1244_v11 = vld [vmem:[%s1200_s14 + $0x58] sm:$0xff]  ;;  %v1247_v12 = vld [vmem:[%s1200_s14 + $0x60] sm:$0xff]  ;;  %v1250_v13 = vld [vmem:[%s1200_s14 + $0x68] sm:$0xff] }
  0x4c   : > { %v1253_v14 = vld [vmem:[%s1200_s14 + $0x70] sm:$0xff]  ;;  %v1256_v15 = vld [vmem:[%s1200_s14 + $0x78] sm:$0xff]  ;;  %v1259_v16 = vld [vmem:[%s1200_s14 + $0x80] sm:$0xff] }
  0x4d   : > { %v1262_v17 = vld [vmem:[%s1200_s14 + $0x88] sm:$0xff]  ;;  %v1265_v18 = vld [vmem:[%s1200_s14 + $0x90] sm:$0xff]  ;;  %v1268_v19 = vld [vmem:[%s1200_s14 + $0x98] sm:$0xff]  ;;  %p885_p9 = scmp.eq.s32.totalorder %s1208_s29, 0 }
  0x4e   : > { %v1271_v20 = vld [vmem:[%s1200_s14 + $0xa0] sm:$0xff]  ;;  %v1274_v21 = vld [vmem:[%s1200_s14 + $0xa8] sm:$0xff]  ;;  %v1277_v22 = vld [vmem:[%s1200_s14 + $0xb0] sm:$0xff]  ;;  %273 = vst [vmem:[%s1596_s11] sm:$0xff] (!%p885_p9), %v1211_v0 }
  0x4f   : > { %v1280_v23 = vld [vmem:[%s1200_s14 + $0xb8] sm:$0xff]  ;;  %v1283_v24 = vld [vmem:[%s1200_s14 + $0xc0] sm:$0xff]  ;;  %v1286_v25 = vld [vmem:[%s1200_s14 + $0xc8] sm:$0xff]  ;;  %275 = vst [vmem:[%s1596_s11 + $0x10] sm:$0xff] (!%p885_p9), %v1214_v1 }
  0x50   : > { %v1289_v26 = vld [vmem:[%s1200_s14 + $0xd0] sm:$0xff]  ;;  %v1292_v27 = vld [vmem:[%s1200_s14 + $0xd8] sm:$0xff]  ;;  %v1295_v28 = vld [vmem:[%s1200_s14 + $0xe0] sm:$0xff]  ;;  %277 = vst [vmem:[%s1596_s11 + $0x20] sm:$0xff] (!%p885_p9), %v1217_v2 }
  0x51   : > { %v1298_v29 = vld [vmem:[%s1200_s14 + $0xe8] sm:$0xff]  ;;  %v1301_v30 = vld [vmem:[%s1200_s14 + $0xf0] sm:$0xff]  ;;  %v1304_v31 = vld [vmem:[%s1200_s14 + $0xf8] sm:$0xff]  ;;  %279 = vst [vmem:[%s1596_s11 + $0x30] sm:$0xff] (!%p885_p9), %v1220_v3 }
  0x52   : > { %v1307_v32 = vld [vmem:[%s1200_s14 + $0x100] sm:$0xff]  ;;  %v1310_v33 = vld [vmem:[%s1200_s14 + $0x108] sm:$0xff]  ;;  %v1313_v34 = vld [vmem:[%s1200_s14 + $0x110] sm:$0xff]  ;;  %281 = vst [vmem:[%s1596_s11 + $0x40] sm:$0xff] (!%p885_p9), %v1223_v4 }
  0x53   : > { %v1316_v35 = vld [vmem:[%s1200_s14 + $0x118] sm:$0xff]  ;;  %v1319_v36 = vld [vmem:[%s1200_s14 + $0x120] sm:$0xff]  ;;  %v1322_v37 = vld [vmem:[%s1200_s14 + $0x128] sm:$0xff]  ;;  %283 = vst [vmem:[%s1596_s11 + $0x50] sm:$0xff] (!%p885_p9), %v1226_v5 }
  0x54   : > { %v1325_v38 = vld [vmem:[%s1200_s14 + $0x130] sm:$0xff]  ;;  %v1328_v39 = vld [vmem:[%s1200_s14 + $0x138] sm:$0xff]  ;;  %v1331_v40 = vld [vmem:[%s1200_s14 + $0x140] sm:$0xff]  ;;  %285 = vst [vmem:[%s1596_s11 + $0x60] sm:$0xff] (!%p885_p9), %v1229_v6 }
  0x55   : > { %v1334_v41 = vld [vmem:[%s1200_s14 + $0x148] sm:$0xff]  ;;  %v1337_v42 = vld [vmem:[%s1200_s14 + $0x150] sm:$0xff]  ;;  %v1340_v43 = vld [vmem:[%s1200_s14 + $0x158] sm:$0xff]  ;;  %287 = vst [vmem:[%s1596_s11 + $0x70] sm:$0xff] (!%p885_p9), %v1232_v7 }
  0x56   : > { %v1343_v44 = vld [vmem:[%s1200_s14 + $0x160] sm:$0xff]  ;;  %v1346_v45 = vld [vmem:[%s1200_s14 + $0x168] sm:$0xff]  ;;  %v1349_v46 = vld [vmem:[%s1200_s14 + $0x170] sm:$0xff]  ;;  %289 = vst [vmem:[%s1596_s11 + $0x80] sm:$0xff] (!%p885_p9), %v1235_v8 }
  0x57   : > { %2691 = vst [vmem:[#allocation11_spill] sm:$0xff] %v1346_v45  ;;  %2692 = vst [vmem:[#allocation12_spill] sm:$0xff] %v1349_v46  ;;  %v1352_v47 = vld [vmem:[%s1200_s14 + $0x178] sm:$0xff]  ;;  %v1355_v48 = vld [vmem:[%s1200_s14 + $0x180] sm:$0xff] }
  0x58   : > { %2693 = vst [vmem:[#allocation13_spill] sm:$0xff] %v1352_v47  ;;  %2694 = vst [vmem:[#allocation14_spill] sm:$0xff] %v1355_v48  ;;  %v1358_v49 = vld [vmem:[%s1200_s14 + $0x188] sm:$0xff]  ;;  %v1361_v50 = vld [vmem:[%s1200_s14 + $0x190] sm:$0xff] }
  0x59   : > { %2695 = vst [vmem:[#allocation15_spill] sm:$0xff] %v1358_v49  ;;  %2696 = vst [vmem:[#allocation16_spill] sm:$0xff] %v1361_v50  ;;  %v1364_v51 = vld [vmem:[%s1200_s14 + $0x198] sm:$0xff]  ;;  %v1367_v52 = vld [vmem:[%s1200_s14 + $0x1a0] sm:$0xff] }
  0x5a   : > { %2697 = vst [vmem:[#allocation17_spill] sm:$0xff] %v1364_v51  ;;  %2698 = vst [vmem:[#allocation18_spill] sm:$0xff] %v1367_v52  ;;  %v1370_v53 = vld [vmem:[%s1200_s14 + $0x1a8] sm:$0xff]  ;;  %v1373_v54 = vld [vmem:[%s1200_s14 + $0x1b0] sm:$0xff] }
  0x5b   : > { %2699 = vst [vmem:[#allocation19_spill] sm:$0xff] %v1370_v53  ;;  %2700 = vst [vmem:[#allocation20_spill] sm:$0xff] %v1373_v54  ;;  %v1376_v55 = vld [vmem:[%s1200_s14 + $0x1b8] sm:$0xff]  ;;  %v1379_v56 = vld [vmem:[%s1200_s14 + $0x1c0] sm:$0xff] }
  0x5c   : > { %2701 = vst [vmem:[#allocation21_spill] sm:$0xff] %v1376_v55  ;;  %2702 = vst [vmem:[#allocation22_spill] sm:$0xff] %v1379_v56  ;;  %v1382_v57 = vld [vmem:[%s1200_s14 + $0x1c8] sm:$0xff]  ;;  %v1385_v58 = vld [vmem:[%s1200_s14 + $0x1d0] sm:$0xff] }
  0x5d   : > { %2703 = vst [vmem:[#allocation23_spill] sm:$0xff] %v1382_v57  ;;  %2704 = vst [vmem:[#allocation24_spill] sm:$0xff] %v1385_v58  ;;  %v1388_v59 = vld [vmem:[%s1200_s14 + $0x1d8] sm:$0xff]  ;;  %v1391_v60 = vld [vmem:[%s1200_s14 + $0x1e0] sm:$0xff] }
  0x5e   : > { %2705 = vst [vmem:[#allocation25_spill] sm:$0xff] %v1388_v59  ;;  %2706 = vst [vmem:[#allocation26_spill] sm:$0xff] %v1391_v60  ;;  %v1394_v61 = vld [vmem:[%s1200_s14 + $0x1e8] sm:$0xff]  ;;  %v1397_v62 = vld [vmem:[%s1200_s14 + $0x1f0] sm:$0xff] }
  0x5f   : > { %2707 = vst [vmem:[#allocation27_spill] sm:$0xff] %v1394_v61  ;;  %2708 = vst [vmem:[#allocation28_spill] sm:$0xff] %v1397_v62  ;;  %v1400_v63 = vld [vmem:[%s1200_s14 + $0x1f8] sm:$0xff]  ;;  %v1403_v57 = vld [vmem:[%s1200_s14 + $0x200] sm:$0xff] }
  0x60   : > { %2709 = vst [vmem:[#allocation29_spill] sm:$0xff] %v1400_v63  ;;  %2710 = vst [vmem:[#allocation30_spill] sm:$0xff] %v1403_v57  ;;  %v1406_v58 = vld [vmem:[%s1200_s14 + $0x208] sm:$0xff]  ;;  %v1409_v59 = vld [vmem:[%s1200_s14 + $0x210] sm:$0xff] }
  0x61   : > { %2711 = vst [vmem:[#allocation31_spill] sm:$0xff] %v1406_v58  ;;  %2712 = vst [vmem:[#allocation32_spill] sm:$0xff] %v1409_v59  ;;  %v1412_v60 = vld [vmem:[%s1200_s14 + $0x218] sm:$0xff]  ;;  %v1415_v61 = vld [vmem:[%s1200_s14 + $0x220] sm:$0xff] }
  0x62   : > { %2713 = vst [vmem:[#allocation33_spill] sm:$0xff] %v1412_v60  ;;  %2714 = vst [vmem:[#allocation34_spill] sm:$0xff] %v1415_v61  ;;  %v1418_v62 = vld [vmem:[%s1200_s14 + $0x228] sm:$0xff]  ;;  %v1421_v63 = vld [vmem:[%s1200_s14 + $0x230] sm:$0xff] }
  0x63   : > { %2715 = vst [vmem:[#allocation35_spill] sm:$0xff] %v1418_v62  ;;  %2716 = vst [vmem:[#allocation36_spill] sm:$0xff] %v1421_v63  ;;  %v1424_v57 = vld [vmem:[%s1200_s14 + $0x238] sm:$0xff]  ;;  %v1427_v58 = vld [vmem:[%s1200_s14 + $0x240] sm:$0xff] }
  0x64   : > { %2717 = vst [vmem:[#allocation37_spill] sm:$0xff] %v1424_v57  ;;  %2718 = vst [vmem:[#allocation38_spill] sm:$0xff] %v1427_v58  ;;  %v1430_v59 = vld [vmem:[%s1200_s14 + $0x248] sm:$0xff]  ;;  %v1433_v60 = vld [vmem:[%s1200_s14 + $0x250] sm:$0xff] }
  0x65   : > { %2719 = vst [vmem:[#allocation39_spill] sm:$0xff] %v1430_v59  ;;  %2720 = vst [vmem:[#allocation40_spill] sm:$0xff] %v1433_v60  ;;  %v1436_v61 = vld [vmem:[%s1200_s14 + $0x258] sm:$0xff]  ;;  %v1439_v62 = vld [vmem:[%s1200_s14 + $0x260] sm:$0xff] }
  0x66   : > { %2721 = vst [vmem:[#allocation41_spill] sm:$0xff] %v1436_v61  ;;  %2722 = vst [vmem:[#allocation42_spill] sm:$0xff] %v1439_v62  ;;  %v1442_v63 = vld [vmem:[%s1200_s14 + $0x268] sm:$0xff]  ;;  %v1445_v57 = vld [vmem:[%s1200_s14 + $0x270] sm:$0xff] }
  0x67   : > { %2723 = vst [vmem:[#allocation43_spill] sm:$0xff] %v1442_v63  ;;  %2724 = vst [vmem:[#allocation44_spill] sm:$0xff] %v1445_v57  ;;  %v1448_v58 = vld [vmem:[%s1200_s14 + $0x278] sm:$0xff]  ;;  %v1451_v59 = vld [vmem:[%s1200_s14 + $0x280] sm:$0xff] }
  0x68   : > { %2725 = vst [vmem:[#allocation45_spill] sm:$0xff] %v1448_v58  ;;  %2726 = vst [vmem:[#allocation46_spill] sm:$0xff] %v1451_v59  ;;  %v1454_v60 = vld [vmem:[%s1200_s14 + $0x288] sm:$0xff]  ;;  %v1457_v61 = vld [vmem:[%s1200_s14 + $0x290] sm:$0xff] }
  0x69   : > { %2727 = vst [vmem:[#allocation47_spill] sm:$0xff] %v1454_v60  ;;  %2728 = vst [vmem:[#allocation48_spill] sm:$0xff] %v1457_v61  ;;  %v1460_v62 = vld [vmem:[%s1200_s14 + $0x298] sm:$0xff]  ;;  %v1463_v63 = vld [vmem:[%s1200_s14 + $0x2a0] sm:$0xff] }
  0x6a   : > { %2729 = vst [vmem:[#allocation49_spill] sm:$0xff] %v1460_v62  ;;  %2730 = vst [vmem:[#allocation50_spill] sm:$0xff] %v1463_v63  ;;  %v1466_v57 = vld [vmem:[%s1200_s14 + $0x2a8] sm:$0xff]  ;;  %v1469_v58 = vld [vmem:[%s1200_s14 + $0x2b0] sm:$0xff] }
  0x6b   : > { %2731 = vst [vmem:[#allocation51_spill] sm:$0xff] %v1466_v57  ;;  %2732 = vst [vmem:[#allocation52_spill] sm:$0xff] %v1469_v58  ;;  %v1472_v59 = vld [vmem:[%s1200_s14 + $0x2b8] sm:$0xff]  ;;  %v1475_v60 = vld [vmem:[%s1200_s14 + $0x2c0] sm:$0xff] }
  0x6c   : > { %2733 = vst [vmem:[#allocation53_spill] sm:$0xff] %v1472_v59  ;;  %2734 = vst [vmem:[#allocation54_spill] sm:$0xff] %v1475_v60  ;;  %v1478_v61 = vld [vmem:[%s1200_s14 + $0x2c8] sm:$0xff]  ;;  %v1481_v62 = vld [vmem:[%s1200_s14 + $0x2d0] sm:$0xff] }
  0x6d   : > { %2735 = vst [vmem:[#allocation55_spill] sm:$0xff] %v1478_v61  ;;  %2736 = vst [vmem:[#allocation56_spill] sm:$0xff] %v1481_v62  ;;  %v1484_v63 = vld [vmem:[%s1200_s14 + $0x2d8] sm:$0xff]  ;;  %v1487_v57 = vld [vmem:[%s1200_s14 + $0x2e0] sm:$0xff] }
  0x6e   : > { %2737 = vst [vmem:[#allocation57_spill] sm:$0xff] %v1484_v63  ;;  %2738 = vst [vmem:[#allocation58_spill] sm:$0xff] %v1487_v57  ;;  %v1490_v58 = vld [vmem:[%s1200_s14 + $0x2e8] sm:$0xff]  ;;  %v1493_v59 = vld [vmem:[%s1200_s14 + $0x2f0] sm:$0xff] }
  0x6f   : > { %2739 = vst [vmem:[#allocation59_spill] sm:$0xff] %v1490_v58  ;;  %2740 = vst [vmem:[#allocation60_spill] sm:$0xff] %v1493_v59  ;;  %v1496_v60 = vld [vmem:[%s1200_s14 + $0x2f8] sm:$0xff]  ;;  %v1499_v61 = vld [vmem:[%s1200_s14 + $0x300] sm:$0xff] }
  0x70   : > { %2741 = vst [vmem:[#allocation61_spill] sm:$0xff] %v1496_v60  ;;  %2742 = vst [vmem:[#allocation62_spill] sm:$0xff] %v1499_v61  ;;  %v1502_v62 = vld [vmem:[%s1200_s14 + $0x308] sm:$0xff]  ;;  %v1505_v63 = vld [vmem:[%s1200_s14 + $0x310] sm:$0xff] }
  0x71   : > { %2743 = vst [vmem:[#allocation63_spill] sm:$0xff] %v1502_v62  ;;  %2744 = vst [vmem:[#allocation64_spill] sm:$0xff] %v1505_v63  ;;  %v1508_v57 = vld [vmem:[%s1200_s14 + $0x318] sm:$0xff]  ;;  %v1511_v58 = vld [vmem:[%s1200_s14 + $0x320] sm:$0xff] }
  0x72   : > { %2745 = vst [vmem:[#allocation65_spill] sm:$0xff] %v1508_v57  ;;  %2746 = vst [vmem:[#allocation66_spill] sm:$0xff] %v1511_v58  ;;  %v1514_v59 = vld [vmem:[%s1200_s14 + $0x328] sm:$0xff]  ;;  %v1517_v60 = vld [vmem:[%s1200_s14 + $0x330] sm:$0xff] }
  0x73   : > { %2747 = vst [vmem:[#allocation67_spill] sm:$0xff] %v1514_v59  ;;  %2748 = vst [vmem:[#allocation68_spill] sm:$0xff] %v1517_v60  ;;  %v1520_v61 = vld [vmem:[%s1200_s14 + $0x338] sm:$0xff]  ;;  %v1523_v62 = vld [vmem:[%s1200_s14 + $0x340] sm:$0xff] }
  0x74   : > { %2749 = vst [vmem:[#allocation69_spill] sm:$0xff] %v1520_v61  ;;  %2750 = vst [vmem:[#allocation70_spill] sm:$0xff] %v1523_v62  ;;  %v1526_v63 = vld [vmem:[%s1200_s14 + $0x348] sm:$0xff]  ;;  %v1529_v57 = vld [vmem:[%s1200_s14 + $0x350] sm:$0xff] }
  0x75   : > { %2751 = vst [vmem:[#allocation71_spill] sm:$0xff] %v1526_v63  ;;  %2752 = vst [vmem:[#allocation72_spill] sm:$0xff] %v1529_v57  ;;  %v1532_v58 = vld [vmem:[%s1200_s14 + $0x358] sm:$0xff]  ;;  %v1535_v59 = vld [vmem:[%s1200_s14 + $0x360] sm:$0xff] }
  0x76   : > { %2753 = vst [vmem:[#allocation73_spill] sm:$0xff] %v1532_v58  ;;  %2754 = vst [vmem:[#allocation74_spill] sm:$0xff] %v1535_v59  ;;  %v1538_v60 = vld [vmem:[%s1200_s14 + $0x368] sm:$0xff]  ;;  %v1541_v61 = vld [vmem:[%s1200_s14 + $0x370] sm:$0xff] }
  0x77   : > { %2755 = vst [vmem:[#allocation75_spill] sm:$0xff] %v1538_v60  ;;  %2756 = vst [vmem:[#allocation76_spill] sm:$0xff] %v1541_v61  ;;  %v1544_v62 = vld [vmem:[%s1200_s14 + $0x378] sm:$0xff]  ;;  %v1547_v63 = vld [vmem:[%s1200_s14 + $0x380] sm:$0xff]  ;;  %272 = sbr.rel (%p885_p9) target bundleno = 248 (0xf8), region = 32 }
  0x78   : > { %2757 = vst [vmem:[#allocation77_spill] sm:$0xff] %v1544_v62  ;;  %2758 = vst [vmem:[#allocation78_spill] sm:$0xff] %v1547_v63  ;;  %v1550_v57 = vld [vmem:[%s1200_s14 + $0x388] sm:$0xff]  ;;  %v1553_v56 = vld [vmem:[%s1200_s14 + $0x390] sm:$0xff] }
  0x79   : > { %2759 = vst [vmem:[#allocation79_spill] sm:$0xff] %v1550_v57  ;;  %2760 = vst [vmem:[#allocation80_spill] sm:$0xff] %v1553_v56  ;;  %v1556_v58 = vld [vmem:[%s1200_s14 + $0x398] sm:$0xff]  ;;  %v1559_v59 = vld [vmem:[%s1200_s14 + $0x3a0] sm:$0xff] }
  0x7a   : > { %2761 = vst [vmem:[#allocation81_spill] sm:$0xff] %v1556_v58  ;;  %2762 = vst [vmem:[#allocation82_spill] sm:$0xff] %v1559_v59  ;;  %v1562_v55 = vld [vmem:[%s1200_s14 + $0x3a8] sm:$0xff]  ;;  %v1565_v60 = vld [vmem:[%s1200_s14 + $0x3b0] sm:$0xff] }
  0x7b   : > { %v1568_v61 = vld [vmem:[%s1200_s14 + $0x3b8] sm:$0xff]  ;;  %v1571_v54 = vld [vmem:[%s1200_s14 + $0x3c0] sm:$0xff]  ;;  %v1574_v62 = vld [vmem:[%s1200_s14 + $0x3c8] sm:$0xff]  ;;  %291 = vst [vmem:[%s1596_s11 + $0x90] sm:$0xff] (!%p885_p9), %v1238_v9 }
  0x7c   : > { %v1577_v63 = vld [vmem:[%s1200_s14 + $0x3d0] sm:$0xff]  ;;  %v1580_v53 = vld [vmem:[%s1200_s14 + $0x3d8] sm:$0xff]  ;;  %v1583_v57 = vld [vmem:[%s1200_s14 + $0x3e0] sm:$0xff]  ;;  %293 = vst [vmem:[%s1596_s11 + $0xa0] sm:$0xff] (!%p885_p9), %v1241_v10 }
  0x7d   : > { %v1586_v56 = vld [vmem:[%s1200_s14 + $0x3e8] sm:$0xff]  ;;  %v1589_v58 = vld [vmem:[%s1200_s14 + $0x3f0] sm:$0xff]  ;;  %v1592_v59 = vld [vmem:[%s1200_s14 + $0x3f8] sm:$0xff]  ;;  %295 = vst [vmem:[%s1596_s11 + $0xb0] sm:$0xff] (!%p885_p9), %v1244_v11 }
  0x7e   : > { %297 = vst [vmem:[%s1596_s11 + $0xc0] sm:$0xff] %v1247_v12  ;;  %299 = vst [vmem:[%s1596_s11 + $0xd0] sm:$0xff] %v1250_v13 }
  0x7f   : > { %301 = vst [vmem:[%s1596_s11 + $0xe0] sm:$0xff] %v1253_v14  ;;  %303 = vst [vmem:[%s1596_s11 + $0xf0] sm:$0xff] %v1256_v15 }
  0x80   : > { %305 = vst [vmem:[%s1596_s11 + $0x100] sm:$0xff] %v1259_v16  ;;  %307 = vst [vmem:[%s1596_s11 + $0x110] sm:$0xff] %v1262_v17 }
  0x81   : > { %309 = vst [vmem:[%s1596_s11 + $0x120] sm:$0xff] %v1265_v18  ;;  %311 = vst [vmem:[%s1596_s11 + $0x130] sm:$0xff] %v1268_v19 }
  0x82   : > { %313 = vst [vmem:[%s1596_s11 + $0x140] sm:$0xff] %v1271_v20  ;;  %315 = vst [vmem:[%s1596_s11 + $0x150] sm:$0xff] %v1274_v21 }
  0x83   : > { %317 = vst [vmem:[%s1596_s11 + $0x160] sm:$0xff] %v1277_v22  ;;  %319 = vst [vmem:[%s1596_s11 + $0x170] sm:$0xff] %v1280_v23 }
  0x84   : > { %321 = vst [vmem:[%s1596_s11 + $0x180] sm:$0xff] %v1283_v24  ;;  %323 = vst [vmem:[%s1596_s11 + $0x190] sm:$0xff] %v1286_v25 }
  0x85   : > { %325 = vst [vmem:[%s1596_s11 + $0x1a0] sm:$0xff] %v1289_v26  ;;  %327 = vst [vmem:[%s1596_s11 + $0x1b0] sm:$0xff] %v1292_v27 }
  0x86   : > { %329 = vst [vmem:[%s1596_s11 + $0x1c0] sm:$0xff] %v1295_v28  ;;  %331 = vst [vmem:[%s1596_s11 + $0x1d0] sm:$0xff] %v1298_v29 }
  0x87   : > { %333 = vst [vmem:[%s1596_s11 + $0x1e0] sm:$0xff] %v1301_v30  ;;  %335 = vst [vmem:[%s1596_s11 + $0x1f0] sm:$0xff] %v1304_v31 }
  0x88   : > { %337 = vst [vmem:[%s1596_s11 + $0x200] sm:$0xff] %v1307_v32  ;;  %339 = vst [vmem:[%s1596_s11 + $0x210] sm:$0xff] %v1310_v33 }
  0x89   : > { %341 = vst [vmem:[%s1596_s11 + $0x220] sm:$0xff] %v1313_v34  ;;  %343 = vst [vmem:[%s1596_s11 + $0x230] sm:$0xff] %v1316_v35 }
  0x8a   : > { %345 = vst [vmem:[%s1596_s11 + $0x240] sm:$0xff] %v1319_v36  ;;  %347 = vst [vmem:[%s1596_s11 + $0x250] sm:$0xff] %v1322_v37 }
  0x8b   : > { %349 = vst [vmem:[%s1596_s11 + $0x260] sm:$0xff] %v1325_v38  ;;  %351 = vst [vmem:[%s1596_s11 + $0x270] sm:$0xff] %v1328_v39 }
  0x8c   : > { %353 = vst [vmem:[%s1596_s11 + $0x280] sm:$0xff] %v1331_v40  ;;  %355 = vst [vmem:[%s1596_s11 + $0x290] sm:$0xff] %v1334_v41 }
  0x8d   : > { %357 = vst [vmem:[%s1596_s11 + $0x2a0] sm:$0xff] %v1337_v42  ;;  %359 = vst [vmem:[%s1596_s11 + $0x2b0] sm:$0xff] %v1340_v43 }
  0x8e   : > { %361 = vst [vmem:[%s1596_s11 + $0x2c0] sm:$0xff] %v1343_v44  ;;  %363 = vst [vmem:[%s1596_s11 + $0x2d0] sm:$0xff] %v1346_v45  ;;  %v2763_v45 = vld [vmem:[#allocation19_spill] sm:$0xff] }
  0x8f   : > { %365 = vst [vmem:[%s1596_s11 + $0x2e0] sm:$0xff] %v1349_v46  ;;  %367 = vst [vmem:[%s1596_s11 + $0x2f0] sm:$0xff] %v1352_v47  ;;  %v2764_v46 = vld [vmem:[#allocation20_spill] sm:$0xff]  ;;  %v2765_v47 = vld [vmem:[#allocation21_spill] sm:$0xff] }
  0x90   : > { %369 = vst [vmem:[%s1596_s11 + $0x300] sm:$0xff] %v1355_v48  ;;  %371 = vst [vmem:[%s1596_s11 + $0x310] sm:$0xff] %v1358_v49  ;;  %v2766_v48 = vld [vmem:[#allocation22_spill] sm:$0xff]  ;;  %v2767_v49 = vld [vmem:[#allocation23_spill] sm:$0xff] }
  0x91   : > { %373 = vst [vmem:[%s1596_s11 + $0x320] sm:$0xff] %v1361_v50  ;;  %375 = vst [vmem:[%s1596_s11 + $0x330] sm:$0xff] %v1364_v51  ;;  %v2768_v50 = vld [vmem:[#allocation24_spill] sm:$0xff]  ;;  %v2769_v51 = vld [vmem:[#allocation25_spill] sm:$0xff] }
  0x92   : > { %377 = vst [vmem:[%s1596_s11 + $0x340] sm:$0xff] %v1367_v52  ;;  %379 = vst [vmem:[%s1596_s11 + $0x350] sm:$0xff] %v2763_v45  ;;  %v2770_v52 = vld [vmem:[#allocation26_spill] sm:$0xff]  ;;  %v2771_v45 = vld [vmem:[#allocation27_spill] sm:$0xff] }
  0x93   : > { %381 = vst [vmem:[%s1596_s11 + $0x360] sm:$0xff] %v2764_v46  ;;  %383 = vst [vmem:[%s1596_s11 + $0x370] sm:$0xff] %v2765_v47  ;;  %v2772_v46 = vld [vmem:[#allocation28_spill] sm:$0xff]  ;;  %v2773_v47 = vld [vmem:[#allocation29_spill] sm:$0xff] }
  0x94   : > { %385 = vst [vmem:[%s1596_s11 + $0x380] sm:$0xff] %v2766_v48  ;;  %387 = vst [vmem:[%s1596_s11 + $0x390] sm:$0xff] %v2767_v49  ;;  %v2774_v48 = vld [vmem:[#allocation30_spill] sm:$0xff]  ;;  %v2775_v49 = vld [vmem:[#allocation31_spill] sm:$0xff] }
  0x95   : > { %389 = vst [vmem:[%s1596_s11 + $0x3a0] sm:$0xff] %v2768_v50  ;;  %391 = vst [vmem:[%s1596_s11 + $0x3b0] sm:$0xff] %v2769_v51  ;;  %v2776_v50 = vld [vmem:[#allocation32_spill] sm:$0xff]  ;;  %v2777_v51 = vld [vmem:[#allocation33_spill] sm:$0xff] }
  0x96   : > { %393 = vst [vmem:[%s1596_s11 + $0x3c0] sm:$0xff] %v2770_v52  ;;  %395 = vst [vmem:[%s1596_s11 + $0x3d0] sm:$0xff] %v2771_v45  ;;  %v2778_v52 = vld [vmem:[#allocation34_spill] sm:$0xff]  ;;  %v2779_v45 = vld [vmem:[#allocation35_spill] sm:$0xff] }
  0x97   : > { %397 = vst [vmem:[%s1596_s11 + $0x3e0] sm:$0xff] %v2772_v46  ;;  %399 = vst [vmem:[%s1596_s11 + $0x3f0] sm:$0xff] %v2773_v47  ;;  %v2780_v46 = vld [vmem:[#allocation36_spill] sm:$0xff]  ;;  %v2781_v47 = vld [vmem:[#allocation37_spill] sm:$0xff] }
  0x98   : > { %401 = vst [vmem:[%s1596_s11 + $0x400] sm:$0xff] %v2774_v48  ;;  %403 = vst [vmem:[%s1596_s11 + $0x410] sm:$0xff] %v2775_v49  ;;  %v2782_v48 = vld [vmem:[#allocation38_spill] sm:$0xff]  ;;  %v2783_v49 = vld [vmem:[#allocation39_spill] sm:$0xff] }
  0x99   : > { %405 = vst [vmem:[%s1596_s11 + $0x420] sm:$0xff] %v2776_v50  ;;  %407 = vst [vmem:[%s1596_s11 + $0x430] sm:$0xff] %v2777_v51  ;;  %v2784_v50 = vld [vmem:[#allocation40_spill] sm:$0xff]  ;;  %v2785_v51 = vld [vmem:[#allocation41_spill] sm:$0xff] }
  0x9a   : > { %409 = vst [vmem:[%s1596_s11 + $0x440] sm:$0xff] %v2778_v52  ;;  %411 = vst [vmem:[%s1596_s11 + $0x450] sm:$0xff] %v2779_v45  ;;  %v2786_v52 = vld [vmem:[#allocation42_spill] sm:$0xff]  ;;  %v2787_v45 = vld [vmem:[#allocation43_spill] sm:$0xff] }
  0x9b   : > { %413 = vst [vmem:[%s1596_s11 + $0x460] sm:$0xff] %v2780_v46  ;;  %415 = vst [vmem:[%s1596_s11 + $0x470] sm:$0xff] %v2781_v47  ;;  %v2788_v46 = vld [vmem:[#allocation44_spill] sm:$0xff]  ;;  %v2789_v47 = vld [vmem:[#allocation45_spill] sm:$0xff] }
  0x9c   : > { %417 = vst [vmem:[%s1596_s11 + $0x480] sm:$0xff] %v2782_v48  ;;  %419 = vst [vmem:[%s1596_s11 + $0x490] sm:$0xff] %v2783_v49  ;;  %v2790_v48 = vld [vmem:[#allocation46_spill] sm:$0xff]  ;;  %v2791_v49 = vld [vmem:[#allocation47_spill] sm:$0xff] }
  0x9d   : > { %421 = vst [vmem:[%s1596_s11 + $0x4a0] sm:$0xff] %v2784_v50  ;;  %423 = vst [vmem:[%s1596_s11 + $0x4b0] sm:$0xff] %v2785_v51  ;;  %v2792_v50 = vld [vmem:[#allocation48_spill] sm:$0xff]  ;;  %v2793_v51 = vld [vmem:[#allocation49_spill] sm:$0xff] }
  0x9e   : > { %425 = vst [vmem:[%s1596_s11 + $0x4c0] sm:$0xff] %v2786_v52  ;;  %427 = vst [vmem:[%s1596_s11 + $0x4d0] sm:$0xff] %v2787_v45  ;;  %v2794_v52 = vld [vmem:[#allocation50_spill] sm:$0xff]  ;;  %v2795_v45 = vld [vmem:[#allocation51_spill] sm:$0xff] }
  0x9f   : > { %429 = vst [vmem:[%s1596_s11 + $0x4e0] sm:$0xff] %v2788_v46  ;;  %431 = vst [vmem:[%s1596_s11 + $0x4f0] sm:$0xff] %v2789_v47  ;;  %v2796_v46 = vld [vmem:[#allocation52_spill] sm:$0xff]  ;;  %v2797_v47 = vld [vmem:[#allocation53_spill] sm:$0xff] }
  0xa0   : > { %433 = vst [vmem:[%s1596_s11 + $0x500] sm:$0xff] %v2790_v48  ;;  %435 = vst [vmem:[%s1596_s11 + $0x510] sm:$0xff] %v2791_v49  ;;  %v2798_v48 = vld [vmem:[#allocation54_spill] sm:$0xff]  ;;  %v2799_v49 = vld [vmem:[#allocation55_spill] sm:$0xff] }
  0xa1   : > { %437 = vst [vmem:[%s1596_s11 + $0x520] sm:$0xff] %v2792_v50  ;;  %439 = vst [vmem:[%s1596_s11 + $0x530] sm:$0xff] %v2793_v51  ;;  %v2800_v50 = vld [vmem:[#allocation56_spill] sm:$0xff]  ;;  %v2801_v51 = vld [vmem:[#allocation57_spill] sm:$0xff] }
  0xa2   : > { %441 = vst [vmem:[%s1596_s11 + $0x540] sm:$0xff] %v2794_v52  ;;  %443 = vst [vmem:[%s1596_s11 + $0x550] sm:$0xff] %v2795_v45  ;;  %v2802_v52 = vld [vmem:[#allocation58_spill] sm:$0xff]  ;;  %v2803_v45 = vld [vmem:[#allocation59_spill] sm:$0xff] }
  0xa3   : > { %445 = vst [vmem:[%s1596_s11 + $0x560] sm:$0xff] %v2796_v46  ;;  %447 = vst [vmem:[%s1596_s11 + $0x570] sm:$0xff] %v2797_v47  ;;  %v2804_v46 = vld [vmem:[#allocation60_spill] sm:$0xff]  ;;  %v2805_v47 = vld [vmem:[#allocation61_spill] sm:$0xff] }
  0xa4   : > { %449 = vst [vmem:[%s1596_s11 + $0x580] sm:$0xff] %v2798_v48  ;;  %451 = vst [vmem:[%s1596_s11 + $0x590] sm:$0xff] %v2799_v49  ;;  %v2806_v48 = vld [vmem:[#allocation62_spill] sm:$0xff]  ;;  %v2807_v49 = vld [vmem:[#allocation63_spill] sm:$0xff] }
  0xa5   : > { %453 = vst [vmem:[%s1596_s11 + $0x5a0] sm:$0xff] %v2800_v50  ;;  %455 = vst [vmem:[%s1596_s11 + $0x5b0] sm:$0xff] %v2801_v51  ;;  %v2808_v50 = vld [vmem:[#allocation64_spill] sm:$0xff]  ;;  %v2809_v51 = vld [vmem:[#allocation65_spill] sm:$0xff] }
  0xa6   : > { %457 = vst [vmem:[%s1596_s11 + $0x5c0] sm:$0xff] %v2802_v52  ;;  %459 = vst [vmem:[%s1596_s11 + $0x5d0] sm:$0xff] %v2803_v45  ;;  %v2810_v52 = vld [vmem:[#allocation66_spill] sm:$0xff]  ;;  %v2811_v45 = vld [vmem:[#allocation67_spill] sm:$0xff] }
  0xa7   : > { %461 = vst [vmem:[%s1596_s11 + $0x5e0] sm:$0xff] %v2804_v46  ;;  %463 = vst [vmem:[%s1596_s11 + $0x5f0] sm:$0xff] %v2805_v47  ;;  %v2812_v46 = vld [vmem:[#allocation68_spill] sm:$0xff]  ;;  %v2813_v47 = vld [vmem:[#allocation69_spill] sm:$0xff] }
  0xa8   : > { %465 = vst [vmem:[%s1596_s11 + $0x600] sm:$0xff] %v2806_v48  ;;  %467 = vst [vmem:[%s1596_s11 + $0x610] sm:$0xff] %v2807_v49  ;;  %v2814_v48 = vld [vmem:[#allocation70_spill] sm:$0xff]  ;;  %v2815_v49 = vld [vmem:[#allocation71_spill] sm:$0xff] }
  0xa9   : > { %469 = vst [vmem:[%s1596_s11 + $0x620] sm:$0xff] %v2808_v50  ;;  %471 = vst [vmem:[%s1596_s11 + $0x630] sm:$0xff] %v2809_v51  ;;  %v2816_v50 = vld [vmem:[#allocation72_spill] sm:$0xff]  ;;  %v2817_v51 = vld [vmem:[#allocation73_spill] sm:$0xff] }
  0xaa   : > { %473 = vst [vmem:[%s1596_s11 + $0x640] sm:$0xff] %v2810_v52  ;;  %475 = vst [vmem:[%s1596_s11 + $0x650] sm:$0xff] %v2811_v45  ;;  %v2818_v52 = vld [vmem:[#allocation74_spill] sm:$0xff]  ;;  %v2819_v45 = vld [vmem:[#allocation75_spill] sm:$0xff] }
  0xab   : > { %477 = vst [vmem:[%s1596_s11 + $0x660] sm:$0xff] %v2812_v46  ;;  %479 = vst [vmem:[%s1596_s11 + $0x670] sm:$0xff] %v2813_v47  ;;  %v2820_v46 = vld [vmem:[#allocation76_spill] sm:$0xff]  ;;  %v2821_v47 = vld [vmem:[#allocation77_spill] sm:$0xff] }
  0xac   : > { %481 = vst [vmem:[%s1596_s11 + $0x680] sm:$0xff] %v2814_v48  ;;  %483 = vst [vmem:[%s1596_s11 + $0x690] sm:$0xff] %v2815_v49  ;;  %v2822_v48 = vld [vmem:[#allocation78_spill] sm:$0xff]  ;;  %v2823_v49 = vld [vmem:[#allocation79_spill] sm:$0xff] }
  0xad   : > { %485 = vst [vmem:[%s1596_s11 + $0x6a0] sm:$0xff] %v2816_v50  ;;  %487 = vst [vmem:[%s1596_s11 + $0x6b0] sm:$0xff] %v2817_v51  ;;  %v2824_v50 = vld [vmem:[#allocation80_spill] sm:$0xff]  ;;  %v2825_v51 = vld [vmem:[#allocation81_spill] sm:$0xff] }
  0xae   : > { %489 = vst [vmem:[%s1596_s11 + $0x6c0] sm:$0xff] %v2818_v52  ;;  %491 = vst [vmem:[%s1596_s11 + $0x6d0] sm:$0xff] %v2819_v45  ;;  %v2826_v52 = vld [vmem:[#allocation82_spill] sm:$0xff]  ;;  %v1061_v45 = vmov 114.0  }
  0xaf   : > { %493 = vst [vmem:[%s1596_s11 + $0x6e0] sm:$0xff] %v2820_v46  ;;  %495 = vst [vmem:[%s1596_s11 + $0x6f0] sm:$0xff] %v2821_v47 }
  0xb0   : > { %497 = vst [vmem:[%s1596_s11 + $0x700] sm:$0xff] %v2822_v48  ;;  %499 = vst [vmem:[%s1596_s11 + $0x710] sm:$0xff] %v2823_v49 }
  0xb1   : > { %501 = vst [vmem:[%s1596_s11 + $0x720] sm:$0xff] %v2824_v50  ;;  %503 = vst [vmem:[%s1596_s11 + $0x730] sm:$0xff] %v2825_v51 }
  0xb2   : > { %505 = vst [vmem:[%s1596_s11 + $0x740] sm:$0xff] %v2826_v52  ;;  %507 = vst [vmem:[%s1596_s11 + $0x750] sm:$0xff] %v1562_v55 }
  0xb3   : > { %509 = vst [vmem:[%s1596_s11 + $0x760] sm:$0xff] %v1565_v60  ;;  %511 = vst [vmem:[%s1596_s11 + $0x770] sm:$0xff] %v1568_v61 }
  0xb4   : > { %513 = vst [vmem:[%s1596_s11 + $0x780] sm:$0xff] %v1571_v54  ;;  %515 = vst [vmem:[%s1596_s11 + $0x790] sm:$0xff] %v1574_v62 }
  0xb5   : > { %517 = vst [vmem:[%s1596_s11 + $0x7a0] sm:$0xff] %v1577_v63  ;;  %519 = vst [vmem:[%s1596_s11 + $0x7b0] sm:$0xff] %v1580_v53 }
  0xb6   : > { %521 = vst [vmem:[%s1596_s11 + $0x7c0] sm:$0xff] %v1583_v57  ;;  %523 = vst [vmem:[%s1596_s11 + $0x7d0] sm:$0xff] %v1586_v56 }
  0xb7   : > { %525 = vst [vmem:[%s1596_s11 + $0x7e0] sm:$0xff] %v1589_v58  ;;  %527 = vst [vmem:[%s1596_s11 + $0x7f0] sm:$0xff] %v1592_v59 }
  0xb8   : > { %274 = vst [vmem:[%s1596_s11 + $0x8] sm:$0xff] %v1061_v45  ;;  %276 = vst [vmem:[%s1596_s11 + $0x18] sm:$0xff] %v1061_v45 }
  0xb9   : > { %278 = vst [vmem:[%s1596_s11 + $0x28] sm:$0xff] %v1061_v45  ;;  %280 = vst [vmem:[%s1596_s11 + $0x38] sm:$0xff] %v1061_v45 }
  0xba   : > { %282 = vst [vmem:[%s1596_s11 + $0x48] sm:$0xff] %v1061_v45  ;;  %284 = vst [vmem:[%s1596_s11 + $0x58] sm:$0xff] %v1061_v45 }
  0xbb   : > { %286 = vst [vmem:[%s1596_s11 + $0x68] sm:$0xff] %v1061_v45  ;;  %288 = vst [vmem:[%s1596_s11 + $0x78] sm:$0xff] %v1061_v45 }
  0xbc   : > { %290 = vst [vmem:[%s1596_s11 + $0x88] sm:$0xff] %v1061_v45  ;;  %292 = vst [vmem:[%s1596_s11 + $0x98] sm:$0xff] %v1061_v45 }
  0xbd   : > { %294 = vst [vmem:[%s1596_s11 + $0xa8] sm:$0xff] %v1061_v45  ;;  %296 = vst [vmem:[%s1596_s11 + $0xb8] sm:$0xff] %v1061_v45 }
  0xbe   : > { %298 = vst [vmem:[%s1596_s11 + $0xc8] sm:$0xff] %v1061_v45  ;;  %300 = vst [vmem:[%s1596_s11 + $0xd8] sm:$0xff] %v1061_v45 }
  0xbf   : > { %302 = vst [vmem:[%s1596_s11 + $0xe8] sm:$0xff] %v1061_v45  ;;  %304 = vst [vmem:[%s1596_s11 + $0xf8] sm:$0xff] %v1061_v45 }
  0xc0   : > { %306 = vst [vmem:[%s1596_s11 + $0x108] sm:$0xff] %v1061_v45  ;;  %308 = vst [vmem:[%s1596_s11 + $0x118] sm:$0xff] %v1061_v45 }
  0xc1   : > { %310 = vst [vmem:[%s1596_s11 + $0x128] sm:$0xff] %v1061_v45  ;;  %312 = vst [vmem:[%s1596_s11 + $0x138] sm:$0xff] %v1061_v45 }
  0xc2   : > { %314 = vst [vmem:[%s1596_s11 + $0x148] sm:$0xff] %v1061_v45  ;;  %316 = vst [vmem:[%s1596_s11 + $0x158] sm:$0xff] %v1061_v45 }
  0xc3   : > { %318 = vst [vmem:[%s1596_s11 + $0x168] sm:$0xff] %v1061_v45  ;;  %320 = vst [vmem:[%s1596_s11 + $0x178] sm:$0xff] %v1061_v45 }
  0xc4   : > { %322 = vst [vmem:[%s1596_s11 + $0x188] sm:$0xff] %v1061_v45  ;;  %324 = vst [vmem:[%s1596_s11 + $0x198] sm:$0xff] %v1061_v45 }
  0xc5   : > { %326 = vst [vmem:[%s1596_s11 + $0x1a8] sm:$0xff] %v1061_v45  ;;  %328 = vst [vmem:[%s1596_s11 + $0x1b8] sm:$0xff] %v1061_v45 }
  0xc6   : > { %330 = vst [vmem:[%s1596_s11 + $0x1c8] sm:$0xff] %v1061_v45  ;;  %332 = vst [vmem:[%s1596_s11 + $0x1d8] sm:$0xff] %v1061_v45 }
  0xc7   : > { %334 = vst [vmem:[%s1596_s11 + $0x1e8] sm:$0xff] %v1061_v45  ;;  %336 = vst [vmem:[%s1596_s11 + $0x1f8] sm:$0xff] %v1061_v45 }
  0xc8   : > { %338 = vst [vmem:[%s1596_s11 + $0x208] sm:$0xff] %v1061_v45  ;;  %340 = vst [vmem:[%s1596_s11 + $0x218] sm:$0xff] %v1061_v45 }
  0xc9   : > { %342 = vst [vmem:[%s1596_s11 + $0x228] sm:$0xff] %v1061_v45  ;;  %344 = vst [vmem:[%s1596_s11 + $0x238] sm:$0xff] %v1061_v45 }
  0xca   : > { %346 = vst [vmem:[%s1596_s11 + $0x248] sm:$0xff] %v1061_v45  ;;  %348 = vst [vmem:[%s1596_s11 + $0x258] sm:$0xff] %v1061_v45 }
  0xcb   : > { %350 = vst [vmem:[%s1596_s11 + $0x268] sm:$0xff] %v1061_v45  ;;  %352 = vst [vmem:[%s1596_s11 + $0x278] sm:$0xff] %v1061_v45 }
  0xcc   : > { %354 = vst [vmem:[%s1596_s11 + $0x288] sm:$0xff] %v1061_v45  ;;  %356 = vst [vmem:[%s1596_s11 + $0x298] sm:$0xff] %v1061_v45 }
  0xcd   : > { %358 = vst [vmem:[%s1596_s11 + $0x2a8] sm:$0xff] %v1061_v45  ;;  %360 = vst [vmem:[%s1596_s11 + $0x2b8] sm:$0xff] %v1061_v45 }
  0xce   : > { %362 = vst [vmem:[%s1596_s11 + $0x2c8] sm:$0xff] %v1061_v45  ;;  %364 = vst [vmem:[%s1596_s11 + $0x2d8] sm:$0xff] %v1061_v45 }
  0xcf   : > { %366 = vst [vmem:[%s1596_s11 + $0x2e8] sm:$0xff] %v1061_v45  ;;  %368 = vst [vmem:[%s1596_s11 + $0x2f8] sm:$0xff] %v1061_v45 }
  0xd0   : > { %370 = vst [vmem:[%s1596_s11 + $0x308] sm:$0xff] %v1061_v45  ;;  %372 = vst [vmem:[%s1596_s11 + $0x318] sm:$0xff] %v1061_v45 }
  0xd1   : > { %374 = vst [vmem:[%s1596_s11 + $0x328] sm:$0xff] %v1061_v45  ;;  %376 = vst [vmem:[%s1596_s11 + $0x338] sm:$0xff] %v1061_v45 }
  0xd2   : > { %378 = vst [vmem:[%s1596_s11 + $0x348] sm:$0xff] %v1061_v45  ;;  %380 = vst [vmem:[%s1596_s11 + $0x358] sm:$0xff] %v1061_v45 }
  0xd3   : > { %382 = vst [vmem:[%s1596_s11 + $0x368] sm:$0xff] %v1061_v45  ;;  %384 = vst [vmem:[%s1596_s11 + $0x378] sm:$0xff] %v1061_v45 }
  0xd4   : > { %386 = vst [vmem:[%s1596_s11 + $0x388] sm:$0xff] %v1061_v45  ;;  %388 = vst [vmem:[%s1596_s11 + $0x398] sm:$0xff] %v1061_v45 }
  0xd5   : > { %390 = vst [vmem:[%s1596_s11 + $0x3a8] sm:$0xff] %v1061_v45  ;;  %392 = vst [vmem:[%s1596_s11 + $0x3b8] sm:$0xff] %v1061_v45 }
  0xd6   : > { %394 = vst [vmem:[%s1596_s11 + $0x3c8] sm:$0xff] %v1061_v45  ;;  %396 = vst [vmem:[%s1596_s11 + $0x3d8] sm:$0xff] %v1061_v45 }
  0xd7   : > { %398 = vst [vmem:[%s1596_s11 + $0x3e8] sm:$0xff] %v1061_v45  ;;  %400 = vst [vmem:[%s1596_s11 + $0x3f8] sm:$0xff] %v1061_v45 }
  0xd8   : > { %402 = vst [vmem:[%s1596_s11 + $0x408] sm:$0xff] %v1061_v45  ;;  %404 = vst [vmem:[%s1596_s11 + $0x418] sm:$0xff] %v1061_v45 }
  0xd9   : > { %406 = vst [vmem:[%s1596_s11 + $0x428] sm:$0xff] %v1061_v45  ;;  %408 = vst [vmem:[%s1596_s11 + $0x438] sm:$0xff] %v1061_v45 }
  0xda   : > { %410 = vst [vmem:[%s1596_s11 + $0x448] sm:$0xff] %v1061_v45  ;;  %412 = vst [vmem:[%s1596_s11 + $0x458] sm:$0xff] %v1061_v45 }
  0xdb   : > { %414 = vst [vmem:[%s1596_s11 + $0x468] sm:$0xff] %v1061_v45  ;;  %416 = vst [vmem:[%s1596_s11 + $0x478] sm:$0xff] %v1061_v45 }
  0xdc   : > { %418 = vst [vmem:[%s1596_s11 + $0x488] sm:$0xff] %v1061_v45  ;;  %420 = vst [vmem:[%s1596_s11 + $0x498] sm:$0xff] %v1061_v45 }
  0xdd   : > { %422 = vst [vmem:[%s1596_s11 + $0x4a8] sm:$0xff] %v1061_v45  ;;  %424 = vst [vmem:[%s1596_s11 + $0x4b8] sm:$0xff] %v1061_v45 }
  0xde   : > { %426 = vst [vmem:[%s1596_s11 + $0x4c8] sm:$0xff] %v1061_v45  ;;  %428 = vst [vmem:[%s1596_s11 + $0x4d8] sm:$0xff] %v1061_v45 }
  0xdf   : > { %430 = vst [vmem:[%s1596_s11 + $0x4e8] sm:$0xff] %v1061_v45  ;;  %432 = vst [vmem:[%s1596_s11 + $0x4f8] sm:$0xff] %v1061_v45 }
  0xe0   : > { %434 = vst [vmem:[%s1596_s11 + $0x508] sm:$0xff] %v1061_v45  ;;  %436 = vst [vmem:[%s1596_s11 + $0x518] sm:$0xff] %v1061_v45 }
  0xe1   : > { %438 = vst [vmem:[%s1596_s11 + $0x528] sm:$0xff] %v1061_v45  ;;  %440 = vst [vmem:[%s1596_s11 + $0x538] sm:$0xff] %v1061_v45 }
  0xe2   : > { %442 = vst [vmem:[%s1596_s11 + $0x548] sm:$0xff] %v1061_v45  ;;  %444 = vst [vmem:[%s1596_s11 + $0x558] sm:$0xff] %v1061_v45 }
  0xe3   : > { %446 = vst [vmem:[%s1596_s11 + $0x568] sm:$0xff] %v1061_v45  ;;  %448 = vst [vmem:[%s1596_s11 + $0x578] sm:$0xff] %v1061_v45 }
  0xe4   : > { %450 = vst [vmem:[%s1596_s11 + $0x588] sm:$0xff] %v1061_v45  ;;  %452 = vst [vmem:[%s1596_s11 + $0x598] sm:$0xff] %v1061_v45 }
  0xe5   : > { %454 = vst [vmem:[%s1596_s11 + $0x5a8] sm:$0xff] %v1061_v45  ;;  %456 = vst [vmem:[%s1596_s11 + $0x5b8] sm:$0xff] %v1061_v45 }
  0xe6   : > { %458 = vst [vmem:[%s1596_s11 + $0x5c8] sm:$0xff] %v1061_v45  ;;  %460 = vst [vmem:[%s1596_s11 + $0x5d8] sm:$0xff] %v1061_v45 }
  0xe7   : > { %462 = vst [vmem:[%s1596_s11 + $0x5e8] sm:$0xff] %v1061_v45  ;;  %464 = vst [vmem:[%s1596_s11 + $0x5f8] sm:$0xff] %v1061_v45 }
  0xe8   : > { %466 = vst [vmem:[%s1596_s11 + $0x608] sm:$0xff] %v1061_v45  ;;  %468 = vst [vmem:[%s1596_s11 + $0x618] sm:$0xff] %v1061_v45 }
  0xe9   : > { %470 = vst [vmem:[%s1596_s11 + $0x628] sm:$0xff] %v1061_v45  ;;  %472 = vst [vmem:[%s1596_s11 + $0x638] sm:$0xff] %v1061_v45 }
  0xea   : > { %474 = vst [vmem:[%s1596_s11 + $0x648] sm:$0xff] %v1061_v45  ;;  %476 = vst [vmem:[%s1596_s11 + $0x658] sm:$0xff] %v1061_v45 }
  0xeb   : > { %478 = vst [vmem:[%s1596_s11 + $0x668] sm:$0xff] %v1061_v45  ;;  %480 = vst [vmem:[%s1596_s11 + $0x678] sm:$0xff] %v1061_v45 }
  0xec   : > { %482 = vst [vmem:[%s1596_s11 + $0x688] sm:$0xff] %v1061_v45  ;;  %484 = vst [vmem:[%s1596_s11 + $0x698] sm:$0xff] %v1061_v45 }
  0xed   : > { %486 = vst [vmem:[%s1596_s11 + $0x6a8] sm:$0xff] %v1061_v45  ;;  %488 = vst [vmem:[%s1596_s11 + $0x6b8] sm:$0xff] %v1061_v45 }
  0xee   : > { %490 = vst [vmem:[%s1596_s11 + $0x6c8] sm:$0xff] %v1061_v45  ;;  %492 = vst [vmem:[%s1596_s11 + $0x6d8] sm:$0xff] %v1061_v45 }
  0xef   : > { %494 = vst [vmem:[%s1596_s11 + $0x6e8] sm:$0xff] %v1061_v45  ;;  %496 = vst [vmem:[%s1596_s11 + $0x6f8] sm:$0xff] %v1061_v45 }
  0xf0   : > { %498 = vst [vmem:[%s1596_s11 + $0x708] sm:$0xff] %v1061_v45  ;;  %500 = vst [vmem:[%s1596_s11 + $0x718] sm:$0xff] %v1061_v45 }
  0xf1   : > { %502 = vst [vmem:[%s1596_s11 + $0x728] sm:$0xff] %v1061_v45  ;;  %504 = vst [vmem:[%s1596_s11 + $0x738] sm:$0xff] %v1061_v45 }
  0xf2   : > { %506 = vst [vmem:[%s1596_s11 + $0x748] sm:$0xff] %v1061_v45  ;;  %508 = vst [vmem:[%s1596_s11 + $0x758] sm:$0xff] %v1061_v45 }
  0xf3   : > { %510 = vst [vmem:[%s1596_s11 + $0x768] sm:$0xff] %v1061_v45  ;;  %512 = vst [vmem:[%s1596_s11 + $0x778] sm:$0xff] %v1061_v45 }
  0xf4   : > { %514 = vst [vmem:[%s1596_s11 + $0x788] sm:$0xff] %v1061_v45  ;;  %516 = vst [vmem:[%s1596_s11 + $0x798] sm:$0xff] %v1061_v45 }
  0xf5   : > { %518 = vst [vmem:[%s1596_s11 + $0x7a8] sm:$0xff] %v1061_v45  ;;  %520 = vst [vmem:[%s1596_s11 + $0x7b8] sm:$0xff] %v1061_v45 }
  0xf6   : > { %522 = vst [vmem:[%s1596_s11 + $0x7c8] sm:$0xff] %v1061_v45  ;;  %524 = vst [vmem:[%s1596_s11 + $0x7d8] sm:$0xff] %v1061_v45 }
  0xf7   : > { %526 = vst [vmem:[%s1596_s11 + $0x7e8] sm:$0xff] %v1061_v45  ;;  %528 = vst [vmem:[%s1596_s11 + $0x7f8] sm:$0xff] %v1061_v45 }
  0xf8 PF: > { %p886_p13 = scmp.ne.s32.totalorder %s1208_s29, 0 }
  0xf9   : > { %534 = vst [vmem:[%s1596_s11 + $0x8] sm:$0xff] (!%p886_p13), %v1211_v0  ;;  %536 = vst [vmem:[%s1596_s11 + $0x18] sm:$0xff] (!%p886_p13), %v1214_v1  ;;  %v2827_v0 = vld [vmem:[#allocation11_spill] sm:$0xff] (!%p886_p13)  ;;  %v2828_v1 = vld [vmem:[#allocation12_spill] sm:$0xff] (!%p886_p13) }
  0xfa   : > { %532 = sbr.rel (%p886_p13) target bundleno = 377 (0x179), region = 36  ;;  %538 = vst [vmem:[%s1596_s11 + $0x28] sm:$0xff] (!%p886_p13), %v1217_v2  ;;  %540 = vst [vmem:[%s1596_s11 + $0x38] sm:$0xff] (!%p886_p13), %v1220_v3  ;;  %v2829_v2 = vld [vmem:[#allocation13_spill] sm:$0xff] (!%p886_p13)  ;;  %v2830_v3 = vld [vmem:[#allocation14_spill] sm:$0xff] (!%p886_p13) }
  0xfb   : > { %542 = vst [vmem:[%s1596_s11 + $0x48] sm:$0xff] (!%p886_p13), %v1223_v4  ;;  %544 = vst [vmem:[%s1596_s11 + $0x58] sm:$0xff] (!%p886_p13), %v1226_v5  ;;  %v2831_v4 = vld [vmem:[#allocation15_spill] sm:$0xff] (!%p886_p13)  ;;  %v2832_v5 = vld [vmem:[#allocation16_spill] sm:$0xff] (!%p886_p13) }
  0xfc   : > { %546 = vst [vmem:[%s1596_s11 + $0x68] sm:$0xff] (!%p886_p13), %v1229_v6  ;;  %548 = vst [vmem:[%s1596_s11 + $0x78] sm:$0xff] (!%p886_p13), %v1232_v7  ;;  %v2833_v6 = vld [vmem:[#allocation17_spill] sm:$0xff] (!%p886_p13)  ;;  %v2834_v7 = vld [vmem:[#allocation18_spill] sm:$0xff] (!%p886_p13) }
  0xfd   : > { %550 = vst [vmem:[%s1596_s11 + $0x88] sm:$0xff] (!%p886_p13), %v1235_v8  ;;  %552 = vst [vmem:[%s1596_s11 + $0x98] sm:$0xff] (!%p886_p13), %v1238_v9  ;;  %v2835_v8 = vld [vmem:[#allocation19_spill] sm:$0xff] (!%p886_p13)  ;;  %v2836_v9 = vld [vmem:[#allocation20_spill] sm:$0xff] (!%p886_p13) }
  0xfe   : > { %554 = vst [vmem:[%s1596_s11 + $0xa8] sm:$0xff] (!%p886_p13), %v1241_v10  ;;  %556 = vst [vmem:[%s1596_s11 + $0xb8] sm:$0xff] (!%p886_p13), %v1244_v11  ;;  %v2837_v10 = vld [vmem:[#allocation21_spill] sm:$0xff] (!%p886_p13)  ;;  %v2838_v11 = vld [vmem:[#allocation22_spill] sm:$0xff] (!%p886_p13) }
  0xff   : > { %558 = vst [vmem:[%s1596_s11 + $0xc8] sm:$0xff] (!%p886_p13), %v1247_v12  ;;  %560 = vst [vmem:[%s1596_s11 + $0xd8] sm:$0xff] (!%p886_p13), %v1250_v13  ;;  %v2839_v12 = vld [vmem:[#allocation23_spill] sm:$0xff] (!%p886_p13)  ;;  %v2840_v13 = vld [vmem:[#allocation24_spill] sm:$0xff] (!%p886_p13) }
 0x100   : > { %562 = vst [vmem:[%s1596_s11 + $0xe8] sm:$0xff] (!%p886_p13), %v1253_v14  ;;  %564 = vst [vmem:[%s1596_s11 + $0xf8] sm:$0xff] (!%p886_p13), %v1256_v15  ;;  %v2841_v14 = vld [vmem:[#allocation25_spill] sm:$0xff] (!%p886_p13)  ;;  %v2842_v15 = vld [vmem:[#allocation26_spill] sm:$0xff] (!%p886_p13) }
 0x101   : > { %566 = vst [vmem:[%s1596_s11 + $0x108] sm:$0xff] %v1259_v16  ;;  %568 = vst [vmem:[%s1596_s11 + $0x118] sm:$0xff] %v1262_v17  ;;  %v2843_v16 = vld [vmem:[#allocation27_spill] sm:$0xff]  ;;  %v2844_v17 = vld [vmem:[#allocation28_spill] sm:$0xff] }
 0x102   : > { %570 = vst [vmem:[%s1596_s11 + $0x128] sm:$0xff] %v1265_v18  ;;  %572 = vst [vmem:[%s1596_s11 + $0x138] sm:$0xff] %v1268_v19  ;;  %v2845_v18 = vld [vmem:[#allocation29_spill] sm:$0xff]  ;;  %v2846_v19 = vld [vmem:[#allocation30_spill] sm:$0xff] }
 0x103   : > { %574 = vst [vmem:[%s1596_s11 + $0x148] sm:$0xff] %v1271_v20  ;;  %576 = vst [vmem:[%s1596_s11 + $0x158] sm:$0xff] %v1274_v21  ;;  %v2847_v20 = vld [vmem:[#allocation31_spill] sm:$0xff]  ;;  %v2848_v21 = vld [vmem:[#allocation32_spill] sm:$0xff] }
 0x104   : > { %578 = vst [vmem:[%s1596_s11 + $0x168] sm:$0xff] %v1277_v22  ;;  %580 = vst [vmem:[%s1596_s11 + $0x178] sm:$0xff] %v1280_v23  ;;  %v2849_v22 = vld [vmem:[#allocation33_spill] sm:$0xff]  ;;  %v2850_v23 = vld [vmem:[#allocation34_spill] sm:$0xff] }
 0x105   : > { %582 = vst [vmem:[%s1596_s11 + $0x188] sm:$0xff] %v1283_v24  ;;  %584 = vst [vmem:[%s1596_s11 + $0x198] sm:$0xff] %v1286_v25  ;;  %v2851_v24 = vld [vmem:[#allocation35_spill] sm:$0xff]  ;;  %v2852_v25 = vld [vmem:[#allocation36_spill] sm:$0xff] }
 0x106   : > { %586 = vst [vmem:[%s1596_s11 + $0x1a8] sm:$0xff] %v1289_v26  ;;  %588 = vst [vmem:[%s1596_s11 + $0x1b8] sm:$0xff] %v1292_v27  ;;  %v2853_v26 = vld [vmem:[#allocation37_spill] sm:$0xff]  ;;  %v2854_v27 = vld [vmem:[#allocation38_spill] sm:$0xff] }
 0x107   : > { %590 = vst [vmem:[%s1596_s11 + $0x1c8] sm:$0xff] %v1295_v28  ;;  %592 = vst [vmem:[%s1596_s11 + $0x1d8] sm:$0xff] %v1298_v29  ;;  %v2855_v28 = vld [vmem:[#allocation39_spill] sm:$0xff]  ;;  %v2856_v29 = vld [vmem:[#allocation40_spill] sm:$0xff] }
 0x108   : > { %594 = vst [vmem:[%s1596_s11 + $0x1e8] sm:$0xff] %v1301_v30  ;;  %596 = vst [vmem:[%s1596_s11 + $0x1f8] sm:$0xff] %v1304_v31  ;;  %v2857_v30 = vld [vmem:[#allocation41_spill] sm:$0xff]  ;;  %v2858_v31 = vld [vmem:[#allocation42_spill] sm:$0xff] }
 0x109   : > { %598 = vst [vmem:[%s1596_s11 + $0x208] sm:$0xff] %v1307_v32  ;;  %600 = vst [vmem:[%s1596_s11 + $0x218] sm:$0xff] %v1310_v33  ;;  %v2859_v32 = vld [vmem:[#allocation43_spill] sm:$0xff]  ;;  %v2860_v33 = vld [vmem:[#allocation44_spill] sm:$0xff] }
 0x10a   : > { %602 = vst [vmem:[%s1596_s11 + $0x228] sm:$0xff] %v1313_v34  ;;  %604 = vst [vmem:[%s1596_s11 + $0x238] sm:$0xff] %v1316_v35  ;;  %v2861_v34 = vld [vmem:[#allocation45_spill] sm:$0xff]  ;;  %v2862_v35 = vld [vmem:[#allocation46_spill] sm:$0xff] }
 0x10b   : > { %606 = vst [vmem:[%s1596_s11 + $0x248] sm:$0xff] %v1319_v36  ;;  %608 = vst [vmem:[%s1596_s11 + $0x258] sm:$0xff] %v1322_v37  ;;  %v2863_v36 = vld [vmem:[#allocation47_spill] sm:$0xff]  ;;  %v2864_v37 = vld [vmem:[#allocation48_spill] sm:$0xff] }
 0x10c   : > { %610 = vst [vmem:[%s1596_s11 + $0x268] sm:$0xff] %v1325_v38  ;;  %612 = vst [vmem:[%s1596_s11 + $0x278] sm:$0xff] %v1328_v39  ;;  %v2865_v38 = vld [vmem:[#allocation49_spill] sm:$0xff]  ;;  %v2866_v39 = vld [vmem:[#allocation50_spill] sm:$0xff] }
 0x10d   : > { %614 = vst [vmem:[%s1596_s11 + $0x288] sm:$0xff] %v1331_v40  ;;  %616 = vst [vmem:[%s1596_s11 + $0x298] sm:$0xff] %v1334_v41  ;;  %v2867_v40 = vld [vmem:[#allocation51_spill] sm:$0xff]  ;;  %v2868_v41 = vld [vmem:[#allocation52_spill] sm:$0xff] }
 0x10e   : > { %618 = vst [vmem:[%s1596_s11 + $0x2a8] sm:$0xff] %v1337_v42  ;;  %620 = vst [vmem:[%s1596_s11 + $0x2b8] sm:$0xff] %v1340_v43  ;;  %v2869_v42 = vld [vmem:[#allocation53_spill] sm:$0xff]  ;;  %v2870_v43 = vld [vmem:[#allocation54_spill] sm:$0xff] }
 0x10f   : > { %622 = vst [vmem:[%s1596_s11 + $0x2c8] sm:$0xff] %v1343_v44  ;;  %624 = vst [vmem:[%s1596_s11 + $0x2d8] sm:$0xff] %v2827_v0  ;;  %v2871_v44 = vld [vmem:[#allocation55_spill] sm:$0xff]  ;;  %v2872_v46 = vld [vmem:[#allocation56_spill] sm:$0xff] }
 0x110   : > { %626 = vst [vmem:[%s1596_s11 + $0x2e8] sm:$0xff] %v2828_v1  ;;  %628 = vst [vmem:[%s1596_s11 + $0x2f8] sm:$0xff] %v2829_v2  ;;  %v2873_v47 = vld [vmem:[#allocation57_spill] sm:$0xff]  ;;  %v2874_v48 = vld [vmem:[#allocation58_spill] sm:$0xff] }
 0x111   : > { %630 = vst [vmem:[%s1596_s11 + $0x308] sm:$0xff] %v2830_v3  ;;  %632 = vst [vmem:[%s1596_s11 + $0x318] sm:$0xff] %v2831_v4  ;;  %v2875_v49 = vld [vmem:[#allocation59_spill] sm:$0xff]  ;;  %v2876_v50 = vld [vmem:[#allocation60_spill] sm:$0xff] }
 0x112   : > { %634 = vst [vmem:[%s1596_s11 + $0x328] sm:$0xff] %v2832_v5  ;;  %636 = vst [vmem:[%s1596_s11 + $0x338] sm:$0xff] %v2833_v6  ;;  %v2877_v51 = vld [vmem:[#allocation61_spill] sm:$0xff]  ;;  %v2878_v52 = vld [vmem:[#allocation62_spill] sm:$0xff] }
 0x113   : > { %638 = vst [vmem:[%s1596_s11 + $0x348] sm:$0xff] %v2834_v7  ;;  %640 = vst [vmem:[%s1596_s11 + $0x358] sm:$0xff] %v2835_v8  ;;  %v2879_v45 = vld [vmem:[#allocation63_spill] sm:$0xff]  ;;  %v2880_v0 = vld [vmem:[#allocation64_spill] sm:$0xff] }
 0x114   : > { %642 = vst [vmem:[%s1596_s11 + $0x368] sm:$0xff] %v2836_v9  ;;  %644 = vst [vmem:[%s1596_s11 + $0x378] sm:$0xff] %v2837_v10  ;;  %v2881_v1 = vld [vmem:[#allocation65_spill] sm:$0xff]  ;;  %v2882_v2 = vld [vmem:[#allocation66_spill] sm:$0xff] }
 0x115   : > { %646 = vst [vmem:[%s1596_s11 + $0x388] sm:$0xff] %v2838_v11  ;;  %648 = vst [vmem:[%s1596_s11 + $0x398] sm:$0xff] %v2839_v12  ;;  %v2883_v3 = vld [vmem:[#allocation67_spill] sm:$0xff]  ;;  %v2884_v4 = vld [vmem:[#allocation68_spill] sm:$0xff] }
 0x116   : > { %650 = vst [vmem:[%s1596_s11 + $0x3a8] sm:$0xff] %v2840_v13  ;;  %652 = vst [vmem:[%s1596_s11 + $0x3b8] sm:$0xff] %v2841_v14  ;;  %v2885_v5 = vld [vmem:[#allocation69_spill] sm:$0xff]  ;;  %v2886_v6 = vld [vmem:[#allocation70_spill] sm:$0xff] }
 0x117   : > { %654 = vst [vmem:[%s1596_s11 + $0x3c8] sm:$0xff] %v2842_v15  ;;  %656 = vst [vmem:[%s1596_s11 + $0x3d8] sm:$0xff] %v2843_v16  ;;  %v2887_v7 = vld [vmem:[#allocation71_spill] sm:$0xff]  ;;  %v2888_v8 = vld [vmem:[#allocation72_spill] sm:$0xff] }
 0x118   : > { %658 = vst [vmem:[%s1596_s11 + $0x3e8] sm:$0xff] %v2844_v17  ;;  %660 = vst [vmem:[%s1596_s11 + $0x3f8] sm:$0xff] %v2845_v18  ;;  %v2889_v9 = vld [vmem:[#allocation73_spill] sm:$0xff]  ;;  %v2890_v10 = vld [vmem:[#allocation74_spill] sm:$0xff] }
 0x119   : > { %662 = vst [vmem:[%s1596_s11 + $0x408] sm:$0xff] %v2846_v19  ;;  %664 = vst [vmem:[%s1596_s11 + $0x418] sm:$0xff] %v2847_v20  ;;  %v2891_v11 = vld [vmem:[#allocation75_spill] sm:$0xff]  ;;  %v2892_v12 = vld [vmem:[#allocation76_spill] sm:$0xff] }
 0x11a   : > { %666 = vst [vmem:[%s1596_s11 + $0x428] sm:$0xff] %v2848_v21  ;;  %668 = vst [vmem:[%s1596_s11 + $0x438] sm:$0xff] %v2849_v22  ;;  %v2893_v13 = vld [vmem:[#allocation77_spill] sm:$0xff]  ;;  %v2894_v14 = vld [vmem:[#allocation78_spill] sm:$0xff] }
 0x11b   : > { %670 = vst [vmem:[%s1596_s11 + $0x448] sm:$0xff] %v2850_v23  ;;  %672 = vst [vmem:[%s1596_s11 + $0x458] sm:$0xff] %v2851_v24  ;;  %v2895_v15 = vld [vmem:[#allocation79_spill] sm:$0xff]  ;;  %v2896_v16 = vld [vmem:[#allocation80_spill] sm:$0xff] }
 0x11c   : > { %674 = vst [vmem:[%s1596_s11 + $0x468] sm:$0xff] %v2852_v25  ;;  %676 = vst [vmem:[%s1596_s11 + $0x478] sm:$0xff] %v2853_v26  ;;  %v2897_v17 = vld [vmem:[#allocation81_spill] sm:$0xff]  ;;  %v2898_v18 = vld [vmem:[#allocation82_spill] sm:$0xff] }
 0x11d   : > { %678 = vst [vmem:[%s1596_s11 + $0x488] sm:$0xff] %v2854_v27  ;;  %680 = vst [vmem:[%s1596_s11 + $0x498] sm:$0xff] %v2855_v28 }
 0x11e   : > { %682 = vst [vmem:[%s1596_s11 + $0x4a8] sm:$0xff] %v2856_v29  ;;  %684 = vst [vmem:[%s1596_s11 + $0x4b8] sm:$0xff] %v2857_v30 }
 0x11f   : > { %686 = vst [vmem:[%s1596_s11 + $0x4c8] sm:$0xff] %v2858_v31  ;;  %688 = vst [vmem:[%s1596_s11 + $0x4d8] sm:$0xff] %v2859_v32 }
 0x120   : > { %690 = vst [vmem:[%s1596_s11 + $0x4e8] sm:$0xff] %v2860_v33  ;;  %692 = vst [vmem:[%s1596_s11 + $0x4f8] sm:$0xff] %v2861_v34 }
 0x121   : > { %694 = vst [vmem:[%s1596_s11 + $0x508] sm:$0xff] %v2862_v35  ;;  %696 = vst [vmem:[%s1596_s11 + $0x518] sm:$0xff] %v2863_v36 }
 0x122   : > { %698 = vst [vmem:[%s1596_s11 + $0x528] sm:$0xff] %v2864_v37  ;;  %700 = vst [vmem:[%s1596_s11 + $0x538] sm:$0xff] %v2865_v38 }
 0x123   : > { %702 = vst [vmem:[%s1596_s11 + $0x548] sm:$0xff] %v2866_v39  ;;  %704 = vst [vmem:[%s1596_s11 + $0x558] sm:$0xff] %v2867_v40 }
 0x124   : > { %706 = vst [vmem:[%s1596_s11 + $0x568] sm:$0xff] %v2868_v41  ;;  %708 = vst [vmem:[%s1596_s11 + $0x578] sm:$0xff] %v2869_v42 }
 0x125   : > { %710 = vst [vmem:[%s1596_s11 + $0x588] sm:$0xff] %v2870_v43  ;;  %712 = vst [vmem:[%s1596_s11 + $0x598] sm:$0xff] %v2871_v44 }
 0x126   : > { %714 = vst [vmem:[%s1596_s11 + $0x5a8] sm:$0xff] %v2872_v46  ;;  %716 = vst [vmem:[%s1596_s11 + $0x5b8] sm:$0xff] %v2873_v47 }
 0x127   : > { %718 = vst [vmem:[%s1596_s11 + $0x5c8] sm:$0xff] %v2874_v48  ;;  %720 = vst [vmem:[%s1596_s11 + $0x5d8] sm:$0xff] %v2875_v49 }
 0x128   : > { %722 = vst [vmem:[%s1596_s11 + $0x5e8] sm:$0xff] %v2876_v50  ;;  %724 = vst [vmem:[%s1596_s11 + $0x5f8] sm:$0xff] %v2877_v51 }
 0x129   : > { %726 = vst [vmem:[%s1596_s11 + $0x608] sm:$0xff] %v2878_v52  ;;  %728 = vst [vmem:[%s1596_s11 + $0x618] sm:$0xff] %v2879_v45 }
 0x12a   : > { %730 = vst [vmem:[%s1596_s11 + $0x628] sm:$0xff] %v2880_v0  ;;  %732 = vst [vmem:[%s1596_s11 + $0x638] sm:$0xff] %v2881_v1 }
 0x12b   : > { %734 = vst [vmem:[%s1596_s11 + $0x648] sm:$0xff] %v2882_v2  ;;  %736 = vst [vmem:[%s1596_s11 + $0x658] sm:$0xff] %v2883_v3 }
 0x12c   : > { %738 = vst [vmem:[%s1596_s11 + $0x668] sm:$0xff] %v2884_v4  ;;  %740 = vst [vmem:[%s1596_s11 + $0x678] sm:$0xff] %v2885_v5 }
 0x12d   : > { %742 = vst [vmem:[%s1596_s11 + $0x688] sm:$0xff] %v2886_v6  ;;  %744 = vst [vmem:[%s1596_s11 + $0x698] sm:$0xff] %v2887_v7 }
 0x12e   : > { %746 = vst [vmem:[%s1596_s11 + $0x6a8] sm:$0xff] %v2888_v8  ;;  %748 = vst [vmem:[%s1596_s11 + $0x6b8] sm:$0xff] %v2889_v9 }
 0x12f   : > { %750 = vst [vmem:[%s1596_s11 + $0x6c8] sm:$0xff] %v2890_v10  ;;  %752 = vst [vmem:[%s1596_s11 + $0x6d8] sm:$0xff] %v2891_v11 }
 0x130   : > { %754 = vst [vmem:[%s1596_s11 + $0x6e8] sm:$0xff] %v2892_v12  ;;  %756 = vst [vmem:[%s1596_s11 + $0x6f8] sm:$0xff] %v2893_v13 }
 0x131   : > { %758 = vst [vmem:[%s1596_s11 + $0x708] sm:$0xff] %v2894_v14  ;;  %760 = vst [vmem:[%s1596_s11 + $0x718] sm:$0xff] %v2895_v15 }
 0x132   : > { %762 = vst [vmem:[%s1596_s11 + $0x728] sm:$0xff] %v2896_v16  ;;  %764 = vst [vmem:[%s1596_s11 + $0x738] sm:$0xff] %v2897_v17 }
 0x133   : > { %766 = vst [vmem:[%s1596_s11 + $0x748] sm:$0xff] %v2898_v18  ;;  %768 = vst [vmem:[%s1596_s11 + $0x758] sm:$0xff] %v1562_v55 }
 0x134   : > { %770 = vst [vmem:[%s1596_s11 + $0x768] sm:$0xff] %v1565_v60  ;;  %772 = vst [vmem:[%s1596_s11 + $0x778] sm:$0xff] %v1568_v61 }
 0x135   : > { %774 = vst [vmem:[%s1596_s11 + $0x788] sm:$0xff] %v1571_v54  ;;  %776 = vst [vmem:[%s1596_s11 + $0x798] sm:$0xff] %v1574_v62  ;;  %v1062_v54 = vmov 114.0  }
 0x136   : > { %778 = vst [vmem:[%s1596_s11 + $0x7a8] sm:$0xff] %v1577_v63  ;;  %780 = vst [vmem:[%s1596_s11 + $0x7b8] sm:$0xff] %v1580_v53 }
 0x137   : > { %782 = vst [vmem:[%s1596_s11 + $0x7c8] sm:$0xff] %v1583_v57  ;;  %784 = vst [vmem:[%s1596_s11 + $0x7d8] sm:$0xff] %v1586_v56 }
 0x138   : > { %786 = vst [vmem:[%s1596_s11 + $0x7e8] sm:$0xff] %v1589_v58  ;;  %788 = vst [vmem:[%s1596_s11 + $0x7f8] sm:$0xff] %v1592_v59 }
 0x139   : > { %533 = vst [vmem:[%s1596_s11] sm:$0xff] %v1062_v54  ;;  %535 = vst [vmem:[%s1596_s11 + $0x10] sm:$0xff] %v1062_v54 }
 0x13a   : > { %537 = vst [vmem:[%s1596_s11 + $0x20] sm:$0xff] %v1062_v54  ;;  %539 = vst [vmem:[%s1596_s11 + $0x30] sm:$0xff] %v1062_v54 }
 0x13b   : > { %541 = vst [vmem:[%s1596_s11 + $0x40] sm:$0xff] %v1062_v54  ;;  %543 = vst [vmem:[%s1596_s11 + $0x50] sm:$0xff] %v1062_v54 }
 0x13c   : > { %545 = vst [vmem:[%s1596_s11 + $0x60] sm:$0xff] %v1062_v54  ;;  %547 = vst [vmem:[%s1596_s11 + $0x70] sm:$0xff] %v1062_v54 }
 0x13d   : > { %549 = vst [vmem:[%s1596_s11 + $0x80] sm:$0xff] %v1062_v54  ;;  %551 = vst [vmem:[%s1596_s11 + $0x90] sm:$0xff] %v1062_v54 }
 0x13e   : > { %553 = vst [vmem:[%s1596_s11 + $0xa0] sm:$0xff] %v1062_v54  ;;  %555 = vst [vmem:[%s1596_s11 + $0xb0] sm:$0xff] %v1062_v54 }
 0x13f   : > { %557 = vst [vmem:[%s1596_s11 + $0xc0] sm:$0xff] %v1062_v54  ;;  %559 = vst [vmem:[%s1596_s11 + $0xd0] sm:$0xff] %v1062_v54 }
 0x140   : > { %561 = vst [vmem:[%s1596_s11 + $0xe0] sm:$0xff] %v1062_v54  ;;  %563 = vst [vmem:[%s1596_s11 + $0xf0] sm:$0xff] %v1062_v54 }
 0x141   : > { %565 = vst [vmem:[%s1596_s11 + $0x100] sm:$0xff] %v1062_v54  ;;  %567 = vst [vmem:[%s1596_s11 + $0x110] sm:$0xff] %v1062_v54 }
 0x142   : > { %569 = vst [vmem:[%s1596_s11 + $0x120] sm:$0xff] %v1062_v54  ;;  %571 = vst [vmem:[%s1596_s11 + $0x130] sm:$0xff] %v1062_v54 }
 0x143   : > { %573 = vst [vmem:[%s1596_s11 + $0x140] sm:$0xff] %v1062_v54  ;;  %575 = vst [vmem:[%s1596_s11 + $0x150] sm:$0xff] %v1062_v54 }
 0x144   : > { %577 = vst [vmem:[%s1596_s11 + $0x160] sm:$0xff] %v1062_v54  ;;  %579 = vst [vmem:[%s1596_s11 + $0x170] sm:$0xff] %v1062_v54 }
 0x145   : > { %581 = vst [vmem:[%s1596_s11 + $0x180] sm:$0xff] %v1062_v54  ;;  %583 = vst [vmem:[%s1596_s11 + $0x190] sm:$0xff] %v1062_v54 }
 0x146   : > { %585 = vst [vmem:[%s1596_s11 + $0x1a0] sm:$0xff] %v1062_v54  ;;  %587 = vst [vmem:[%s1596_s11 + $0x1b0] sm:$0xff] %v1062_v54 }
 0x147   : > { %589 = vst [vmem:[%s1596_s11 + $0x1c0] sm:$0xff] %v1062_v54  ;;  %591 = vst [vmem:[%s1596_s11 + $0x1d0] sm:$0xff] %v1062_v54 }
 0x148   : > { %593 = vst [vmem:[%s1596_s11 + $0x1e0] sm:$0xff] %v1062_v54  ;;  %595 = vst [vmem:[%s1596_s11 + $0x1f0] sm:$0xff] %v1062_v54 }
 0x149   : > { %597 = vst [vmem:[%s1596_s11 + $0x200] sm:$0xff] %v1062_v54  ;;  %599 = vst [vmem:[%s1596_s11 + $0x210] sm:$0xff] %v1062_v54 }
 0x14a   : > { %601 = vst [vmem:[%s1596_s11 + $0x220] sm:$0xff] %v1062_v54  ;;  %603 = vst [vmem:[%s1596_s11 + $0x230] sm:$0xff] %v1062_v54 }
 0x14b   : > { %605 = vst [vmem:[%s1596_s11 + $0x240] sm:$0xff] %v1062_v54  ;;  %607 = vst [vmem:[%s1596_s11 + $0x250] sm:$0xff] %v1062_v54 }
 0x14c   : > { %609 = vst [vmem:[%s1596_s11 + $0x260] sm:$0xff] %v1062_v54  ;;  %611 = vst [vmem:[%s1596_s11 + $0x270] sm:$0xff] %v1062_v54 }
 0x14d   : > { %613 = vst [vmem:[%s1596_s11 + $0x280] sm:$0xff] %v1062_v54  ;;  %615 = vst [vmem:[%s1596_s11 + $0x290] sm:$0xff] %v1062_v54 }
 0x14e   : > { %617 = vst [vmem:[%s1596_s11 + $0x2a0] sm:$0xff] %v1062_v54  ;;  %619 = vst [vmem:[%s1596_s11 + $0x2b0] sm:$0xff] %v1062_v54 }
 0x14f   : > { %621 = vst [vmem:[%s1596_s11 + $0x2c0] sm:$0xff] %v1062_v54  ;;  %623 = vst [vmem:[%s1596_s11 + $0x2d0] sm:$0xff] %v1062_v54 }
 0x150   : > { %625 = vst [vmem:[%s1596_s11 + $0x2e0] sm:$0xff] %v1062_v54  ;;  %627 = vst [vmem:[%s1596_s11 + $0x2f0] sm:$0xff] %v1062_v54 }
 0x151   : > { %629 = vst [vmem:[%s1596_s11 + $0x300] sm:$0xff] %v1062_v54  ;;  %631 = vst [vmem:[%s1596_s11 + $0x310] sm:$0xff] %v1062_v54 }
 0x152   : > { %633 = vst [vmem:[%s1596_s11 + $0x320] sm:$0xff] %v1062_v54  ;;  %635 = vst [vmem:[%s1596_s11 + $0x330] sm:$0xff] %v1062_v54 }
 0x153   : > { %637 = vst [vmem:[%s1596_s11 + $0x340] sm:$0xff] %v1062_v54  ;;  %639 = vst [vmem:[%s1596_s11 + $0x350] sm:$0xff] %v1062_v54 }
 0x154   : > { %641 = vst [vmem:[%s1596_s11 + $0x360] sm:$0xff] %v1062_v54  ;;  %643 = vst [vmem:[%s1596_s11 + $0x370] sm:$0xff] %v1062_v54 }
 0x155   : > { %645 = vst [vmem:[%s1596_s11 + $0x380] sm:$0xff] %v1062_v54  ;;  %647 = vst [vmem:[%s1596_s11 + $0x390] sm:$0xff] %v1062_v54 }
 0x156   : > { %649 = vst [vmem:[%s1596_s11 + $0x3a0] sm:$0xff] %v1062_v54  ;;  %651 = vst [vmem:[%s1596_s11 + $0x3b0] sm:$0xff] %v1062_v54 }
 0x157   : > { %653 = vst [vmem:[%s1596_s11 + $0x3c0] sm:$0xff] %v1062_v54  ;;  %655 = vst [vmem:[%s1596_s11 + $0x3d0] sm:$0xff] %v1062_v54 }
 0x158   : > { %657 = vst [vmem:[%s1596_s11 + $0x3e0] sm:$0xff] %v1062_v54  ;;  %659 = vst [vmem:[%s1596_s11 + $0x3f0] sm:$0xff] %v1062_v54 }
 0x159   : > { %661 = vst [vmem:[%s1596_s11 + $0x400] sm:$0xff] %v1062_v54  ;;  %663 = vst [vmem:[%s1596_s11 + $0x410] sm:$0xff] %v1062_v54 }
 0x15a   : > { %665 = vst [vmem:[%s1596_s11 + $0x420] sm:$0xff] %v1062_v54  ;;  %667 = vst [vmem:[%s1596_s11 + $0x430] sm:$0xff] %v1062_v54 }
 0x15b   : > { %669 = vst [vmem:[%s1596_s11 + $0x440] sm:$0xff] %v1062_v54  ;;  %671 = vst [vmem:[%s1596_s11 + $0x450] sm:$0xff] %v1062_v54 }
 0x15c   : > { %673 = vst [vmem:[%s1596_s11 + $0x460] sm:$0xff] %v1062_v54  ;;  %675 = vst [vmem:[%s1596_s11 + $0x470] sm:$0xff] %v1062_v54 }
 0x15d   : > { %677 = vst [vmem:[%s1596_s11 + $0x480] sm:$0xff] %v1062_v54  ;;  %679 = vst [vmem:[%s1596_s11 + $0x490] sm:$0xff] %v1062_v54 }
 0x15e   : > { %681 = vst [vmem:[%s1596_s11 + $0x4a0] sm:$0xff] %v1062_v54  ;;  %683 = vst [vmem:[%s1596_s11 + $0x4b0] sm:$0xff] %v1062_v54 }
 0x15f   : > { %685 = vst [vmem:[%s1596_s11 + $0x4c0] sm:$0xff] %v1062_v54  ;;  %687 = vst [vmem:[%s1596_s11 + $0x4d0] sm:$0xff] %v1062_v54 }
 0x160   : > { %689 = vst [vmem:[%s1596_s11 + $0x4e0] sm:$0xff] %v1062_v54  ;;  %691 = vst [vmem:[%s1596_s11 + $0x4f0] sm:$0xff] %v1062_v54 }
 0x161   : > { %693 = vst [vmem:[%s1596_s11 + $0x500] sm:$0xff] %v1062_v54  ;;  %695 = vst [vmem:[%s1596_s11 + $0x510] sm:$0xff] %v1062_v54 }
 0x162   : > { %697 = vst [vmem:[%s1596_s11 + $0x520] sm:$0xff] %v1062_v54  ;;  %699 = vst [vmem:[%s1596_s11 + $0x530] sm:$0xff] %v1062_v54 }
 0x163   : > { %701 = vst [vmem:[%s1596_s11 + $0x540] sm:$0xff] %v1062_v54  ;;  %703 = vst [vmem:[%s1596_s11 + $0x550] sm:$0xff] %v1062_v54 }
 0x164   : > { %705 = vst [vmem:[%s1596_s11 + $0x560] sm:$0xff] %v1062_v54  ;;  %707 = vst [vmem:[%s1596_s11 + $0x570] sm:$0xff] %v1062_v54 }
 0x165   : > { %709 = vst [vmem:[%s1596_s11 + $0x580] sm:$0xff] %v1062_v54  ;;  %711 = vst [vmem:[%s1596_s11 + $0x590] sm:$0xff] %v1062_v54 }
 0x166   : > { %713 = vst [vmem:[%s1596_s11 + $0x5a0] sm:$0xff] %v1062_v54  ;;  %715 = vst [vmem:[%s1596_s11 + $0x5b0] sm:$0xff] %v1062_v54 }
 0x167   : > { %717 = vst [vmem:[%s1596_s11 + $0x5c0] sm:$0xff] %v1062_v54  ;;  %719 = vst [vmem:[%s1596_s11 + $0x5d0] sm:$0xff] %v1062_v54 }
 0x168   : > { %721 = vst [vmem:[%s1596_s11 + $0x5e0] sm:$0xff] %v1062_v54  ;;  %723 = vst [vmem:[%s1596_s11 + $0x5f0] sm:$0xff] %v1062_v54 }
 0x169   : > { %725 = vst [vmem:[%s1596_s11 + $0x600] sm:$0xff] %v1062_v54  ;;  %727 = vst [vmem:[%s1596_s11 + $0x610] sm:$0xff] %v1062_v54 }
 0x16a   : > { %729 = vst [vmem:[%s1596_s11 + $0x620] sm:$0xff] %v1062_v54  ;;  %731 = vst [vmem:[%s1596_s11 + $0x630] sm:$0xff] %v1062_v54 }
 0x16b   : > { %733 = vst [vmem:[%s1596_s11 + $0x640] sm:$0xff] %v1062_v54  ;;  %735 = vst [vmem:[%s1596_s11 + $0x650] sm:$0xff] %v1062_v54 }
 0x16c   : > { %737 = vst [vmem:[%s1596_s11 + $0x660] sm:$0xff] %v1062_v54  ;;  %739 = vst [vmem:[%s1596_s11 + $0x670] sm:$0xff] %v1062_v54 }
 0x16d   : > { %741 = vst [vmem:[%s1596_s11 + $0x680] sm:$0xff] %v1062_v54  ;;  %743 = vst [vmem:[%s1596_s11 + $0x690] sm:$0xff] %v1062_v54 }
 0x16e   : > { %745 = vst [vmem:[%s1596_s11 + $0x6a0] sm:$0xff] %v1062_v54  ;;  %747 = vst [vmem:[%s1596_s11 + $0x6b0] sm:$0xff] %v1062_v54 }
 0x16f   : > { %749 = vst [vmem:[%s1596_s11 + $0x6c0] sm:$0xff] %v1062_v54  ;;  %751 = vst [vmem:[%s1596_s11 + $0x6d0] sm:$0xff] %v1062_v54 }
 0x170   : > { %753 = vst [vmem:[%s1596_s11 + $0x6e0] sm:$0xff] %v1062_v54  ;;  %755 = vst [vmem:[%s1596_s11 + $0x6f0] sm:$0xff] %v1062_v54 }
 0x171   : > { %757 = vst [vmem:[%s1596_s11 + $0x700] sm:$0xff] %v1062_v54  ;;  %759 = vst [vmem:[%s1596_s11 + $0x710] sm:$0xff] %v1062_v54 }
 0x172   : > { %761 = vst [vmem:[%s1596_s11 + $0x720] sm:$0xff] %v1062_v54  ;;  %763 = vst [vmem:[%s1596_s11 + $0x730] sm:$0xff] %v1062_v54 }
 0x173   : > { %765 = vst [vmem:[%s1596_s11 + $0x740] sm:$0xff] %v1062_v54  ;;  %767 = vst [vmem:[%s1596_s11 + $0x750] sm:$0xff] %v1062_v54 }
 0x174   : > { %769 = vst [vmem:[%s1596_s11 + $0x760] sm:$0xff] %v1062_v54  ;;  %771 = vst [vmem:[%s1596_s11 + $0x770] sm:$0xff] %v1062_v54 }
 0x175   : > { %773 = vst [vmem:[%s1596_s11 + $0x780] sm:$0xff] %v1062_v54  ;;  %775 = vst [vmem:[%s1596_s11 + $0x790] sm:$0xff] %v1062_v54 }
 0x176   : > { %777 = vst [vmem:[%s1596_s11 + $0x7a0] sm:$0xff] %v1062_v54  ;;  %779 = vst [vmem:[%s1596_s11 + $0x7b0] sm:$0xff] %v1062_v54 }
 0x177   : > { %781 = vst [vmem:[%s1596_s11 + $0x7c0] sm:$0xff] %v1062_v54  ;;  %783 = vst [vmem:[%s1596_s11 + $0x7d0] sm:$0xff] %v1062_v54 }
 0x178   : > { %785 = vst [vmem:[%s1596_s11 + $0x7e0] sm:$0xff] %v1062_v54  ;;  %787 = vst [vmem:[%s1596_s11 + $0x7f0] sm:$0xff] %v1062_v54 }
 0x179 PF: > { %s893_s12 = sshll.u32 %s1114_s0, 15  ;;  %s803_s17 = sshll.u32 %s1596_s11, 4  ;;  %s2631_s17 = int_to_ptr.vmem [resolvable:$true] %s803_s17 }
 0x17a   : > { %s2628_s16 = scalar_lea.hbm %s2676_s2, %s893_s12  ;;  %s790_s18 = scalar_lea.sflag [#allocation6], %s1196_s7 }
 0x17b   : > { %s987_s23 = scalar_lea.vmem %s2631_s17, 32768  ;;  %p2899_p1 = scmp.ne.s32.totalorder %s2688_s30, 0 }
 0x17c   : > { %p988_p0 = scmp.ne.s32.totalorder %s2631_s17, %s987_s23  ;;  %s1063_s25 = smov [#allocation7]  }
 0x17d   : > { %s991_s26 = sshll.u32 %s1063_s25, 4  ;;  %s992_s26 = int_to_ptr.vmem [resolvable:$false] %s991_s26 }
 0x17e   : > { %p989_p11 = pnand %p988_p0, %p2899_p1  ;;  %s993_s0 = scalar_lea.vmem %s992_s26, 65536 }
 0x17f   : > { %p994_p2 = scmp.lt.s32.totalorder %s2631_s17, %s992_s26  ;;  %p995_p4 = scmp.lt.s32.totalorder %s993_s0, %s987_s23 }
 0x180   : > { %p990_p12 = pneg %p989_p11 }
 0x181   : > { %p996_p6 = por %p995_p4, %p994_p2 }
 0x183   : > { %p997_p7 = pnand %p996_p6, %p990_p12 }
 0x185   : > { %1000 = shalt.err (!%p997_p7)
}
 0x186   : > { %s1001_s28 = scalar_lea.hbm %s2628_s16, 32768  ;;  %s1005_s6 = scalar_lea.hbm %s2676_s2, 131072 }
 0x187   : > { %p1002_p8 = scmp.ne.s32.totalorder %s2628_s16, %s1001_s28  ;;  %p1006_p10 = scmp.lt.u32.totalorder %s2628_s16, %s2676_s2 }
 0x188   : > { %p1007_p9 = scmp.lt.u32.totalorder %s1005_s6, %s1001_s28  ;;  %p1009_p0 = scmp.lt.u32.totalorder %s1001_s28, %s2628_s16 }
 0x189   : > { %p1003_p3 = pnand %p1002_p8, %p2899_p1 }
 0x18a   : > { %p1008_p13 = por %p1007_p9, %p1006_p10 }
 0x18b   : > { %p1004_p5 = pneg %p1003_p3 }
 0x18c   : > { %p1010_p11 = por %p1009_p0, %p1008_p13 }
 0x18e   : > { %p1011_p12 = pnand %p1010_p11, %p1004_p5 }
 0x190   : > { %1014 = shalt.err (!%p1011_p12)
}
 0x191   : > { %s1064_s14 = smov 256   ;;  %s1065_s9 = smov 16  }
 0x192   : > { %896 = dma.vmem_to_hbm [thread:$0]  (%p2899_p1), %s2631_s17, 32768, %s2628_s16, %s790_s18, %s1064_s14, %s1064_s14, %s1065_s9  }
 0x193 PF: > { %p907_p2 = scmp.ge.s32.totalorder %s1055_s22, 2  ;;  %s818_s29 = sand.u32 1, %s1043_s19  }
 0x194   : > { %p2900_p4 = scmp.ne.s32.totalorder %s2689_s3, 0  ;;  %s819_s11 = scalar_lea.sflag [#allocation6], %s818_s29 }
 0x196   : > { %p903_p6 = pnand %p907_p2, %p2900_p4 }
 0x198   : > { %1038 = dma.done.wait (!%p903_p6), %s819_s11, 32768  }
 0x199   : > { %1040 = vsyncadd (!%p903_p6), %s819_s11, 4294934528  ;;  %p19_p7 = scmp.ge.s32.totalorder %s1118_s24, 6   ;;  %s2901_s19 = smov %s1047_s20 }
 0x19a   : > { %s2902_s20 = smov %s1051_s21  ;;  %s2903_s21 = smov %s1130_s27 }
 0x19b   : > { %s2904_s22 = smov %s1118_s24  ;;  %21 = sbr.rel (!%p19_p7) target bundleno = 17 (0x11), region = 77 }
 0x1a2   :  { %824 = vsyncpa [#allocation5], 1 }
 0x1a3   :  { %826 = vsyncpa [#allocation5 + $0x1], 1 }
 0x1a4   :  { %827 = vsyncpa [#allocation6], 1 }
 0x1a5   :  { %829 = vsyncpa [#allocation6 + $0x1], 1 }

</bundles_post_ra>
